<compile_context>
chip_gen: v7x
topology: tpu7x:2x2x1
jax: 0.10.0
libtpu: 0.0.40
codegen_flags: <defaults>
</compile_context>

<pallas_src>
import numpy as np
import jax
import jax.numpy as jnp
from jax.experimental import pallas as pl
from jax.experimental.pallas import tpu as pltpu

BN_EPS = 1e-5


# ----------------------------------------------------------------------------
# Fused kernel: ReLU -> AvgPool(5,3) -> 1x1 conv (+BN shift) -> ReLU
#               -> 2x2 conv (+BN shift) -> ReLU -> Linear
# Processes one batch element per grid step; everything stays in VMEM.
def _aux_head_kernel(x_ref, w1_ref, b1_ref, w2_ref, b2_ref, wc_ref, bc_ref, o_ref):
    # x_ref : (1, 8, 8, C)   NHWC activation
    # w1_ref: (C, 128)       1x1 conv weight with BN1 scale folded in
    # b1_ref: (1, 128)       BN1 shift
    # w2_ref: (4, 128, 768)  2x2 conv weight, (kh*2+kw, cin, cout), BN2 scale folded
    # b2_ref: (1, 768)       BN2 shift
    # wc_ref: (768, nc)      classifier weight
    # bc_ref: (1, nc)        classifier bias
    # o_ref : (1, 1, nc)
    x = jnp.maximum(x_ref[0], 0.0)                                    # ReLU, (8,8,C)

    # AvgPool2d(5, stride=3, padding=0): output positions (0,0),(0,1),(1,0),(1,1)
    # correspond to input window origins (0,0),(0,3),(3,0),(3,3).
    # (count_include_pad is irrelevant: padding=0 -> every window is full.)
    def pool5x5(h0, w0):
        win = x[h0:h0 + 5, w0:w0 + 5, :]                              # (5,5,C)
        s = jnp.sum(win, axis=0)                                      # (5,C)
        return jnp.sum(s, axis=0, keepdims=True) * (1.0 / 25.0)       # (1,C)

    # Rows ordered by (kh, kw) of the pooled 2x2 map -> matches w2 layout.
    p = jnp.concatenate(
        [pool5x5(0, 0), pool5x5(0, 3), pool5x5(3, 0), pool5x5(3, 3)], axis=0)  # (4,C)

    # 1x1 conv + folded BN + ReLU  -> (4, 128)
    y = jnp.dot(p, w1_ref[...], preferred_element_type=jnp.float32) + b1_ref[...]
    y = jnp.maximum(y, 0.0)

    # 2x2 conv on the 2x2 map == sum over the four (kh,kw) taps of (1,128)x(128,768)
    z = jnp.dot(y[0:1, :], w2_ref[0], preferred_element_type=jnp.float32)
    for r in range(1, 4):
        z = z + jnp.dot(y[r:r + 1, :], w2_ref[r], preferred_element_type=jnp.float32)
    z = jnp.maximum(z + b2_ref[...], 0.0)                             # (1,768)

    # Classifier
    o_ref[0] = jnp.dot(z, wc_ref[...], preferred_element_type=jnp.float32) + bc_ref[...]


def aux_head_forward(x_nchw, kp):
    """x_nchw: (N, C, 8, 8) float -> (N, num_classes)."""
    N, C, H, W = x_nchw.shape
    assert (H, W) == (8, 8), "AuxiliaryHeadCIFAR assumes 8x8 input"
    nc = kp['wc'].shape[-1]
    x = jnp.transpose(x_nchw, (0, 2, 3, 1)).astype(jnp.float32)       # NHWC

    out = pl.pallas_call(
        _aux_head_kernel,
        out_shape=jax.ShapeDtypeStruct((N, 1, nc), jnp.float32),
        grid=(N,),
        in_specs=[
            pl.BlockSpec((1, H, W, C), lambda n: (n, 0, 0, 0)),
            pl.BlockSpec((C, 128), lambda n: (0, 0)),
            pl.BlockSpec((1, 128), lambda n: (0, 0)),
            pl.BlockSpec((4, 128, 768), lambda n: (0, 0, 0)),
            pl.BlockSpec((1, 768), lambda n: (0, 0)),
            pl.BlockSpec((768, nc), lambda n: (0, 0)),
            pl.BlockSpec((1, nc), lambda n: (0, 0)),
        ],
        out_specs=pl.BlockSpec((1, 1, nc), lambda n: (n, 0, 0)),
        compiler_params=pltpu.CompilerParams(
            dimension_semantics=("parallel",)),                       # v7x: 2 TCs get work
    )(x, kp['w1'], kp['b1'], kp['w2'], kp['b2'], kp['wc'], kp['bc'])
    return out.reshape(N, nc)


# ----------------------------------------------------------------------------
class AuxiliaryHeadCIFARPallas:
    """Parameters kept in PyTorch layout for the reference; a folded,
    kernel-friendly copy is built once at init."""

    def __init__(self, C, num_classes, key):
        ks = jax.random.split(key, 6)
        self.C, self.num_classes = C, num_classes
        # Raw params (PyTorch layouts)
        self.w1_oihw = 0.1 * jax.random.normal(ks[0], (128, C, 1, 1), jnp.float32)
        self.bn1 = self._bn_params(ks[1], 128)
        self.w2_oihw = 0.05 * jax.random.normal(ks[2], (768, 128, 2, 2), jnp.float32)
        self.bn2 = self._bn_params(ks[3], 768)
        self.wc_oi = 0.05 * jax.random.normal(ks[4], (num_classes, 768), jnp.float32)
        self.bc = 0.1 * jax.random.normal(ks[5], (num_classes,), jnp.float32)

        # Fold eval-mode BN scale into the conv weights; keep only the shift.
        s1, sh1 = self._fold(self.bn1)
        s2, sh2 = self._fold(self.bn2)
        w1_cio = jnp.transpose(self.w1_oihw[:, :, 0, 0], (1, 0))            # (C, 128)
        w2_hwio = jnp.transpose(self.w2_oihw, (2, 3, 1, 0))                 # (2,2,128,768)
        w2_k = w2_hwio.reshape(4, 128, 768)                                 # (kh*2+kw, cin, cout)
        self.kparams = dict(
            w1=w1_cio * s1[None, :],
            b1=sh1[None, :],
            w2=w2_k * s2[None, None, :],
            b2=sh2[None, :],
            wc=jnp.transpose(self.wc_oi, (1, 0)),                           # (768, nc)
            bc=self.bc[None, :],
        )

    @staticmethod
    def _bn_params(key, C):
        k1, k2, k3, k4 = jax.random.split(key, 4)
        gamma = jax.random.uniform(k1, (C,), jnp.float32, 0.5, 1.5)
        beta = 0.1 * jax.random.normal(k2, (C,), jnp.float32)
        mean = 0.1 * jax.random.normal(k3, (C,), jnp.float32)
        var = jax.random.uniform(k4, (C,), jnp.float32, 0.5, 1.5)
        return gamma, beta, mean, var

    @staticmethod
    def _fold(bn):
        gamma, beta, mean, var = bn
        scale = gamma / jnp.sqrt(var + BN_EPS)
        return scale, beta - mean * scale

    # ----- fused Pallas forward -----
    def __call__(self, x_nchw):
        return aux_head_forward(x_nchw, self.kparams)

    # ----- pure-JAX reference (mirrors PyTorch exactly, un-folded BN) -----
    @staticmethod
    def _bn_apply(x, bn):
        gamma, beta, mean, var = bn
        inv = gamma / jnp.sqrt(var + BN_EPS)
        return (x - mean[None, :, None, None]) * inv[None, :, None, None] \
            + beta[None, :, None, None]

    def reference(self, x_nchw):
        y = jnp.maximum(x_nchw.astype(jnp.float32), 0.0)
        y = jax.lax.reduce_window(y, 0.0, jax.lax.add,
                                  (1, 1, 5, 5), (1, 1, 3, 3), 'VALID') / 25.0
        y = jax.lax.conv_general_dilated(y, self.w1_oihw, (1, 1), 'VALID',
                                         dimension_numbers=('NCHW', 'OIHW', 'NCHW'))
        y = jnp.maximum(self._bn_apply(y, self.bn1), 0.0)
        y = jax.lax.conv_general_dilated(y, self.w2_oihw, (1, 1), 'VALID',
                                         dimension_numbers=('NCHW', 'OIHW', 'NCHW'))
        y = jnp.maximum(self._bn_apply(y, self.bn2), 0.0)
        y = y.reshape(y.shape[0], -1)                                 # (N, 768)
        return y @ self.wc_oi.T + self.bc


# ----------------------------------------------------------------------------
if __name__ == "__main__":
    key = jax.random.PRNGKey(0)
    kx, kp = jax.random.split(key)

    N, C, num_classes = 2, 64, 10          # aux head assumes 8x8 spatial input
    x = jax.random.normal(kx, (N, C, 8, 8), jnp.float32)   # NCHW, like PyTorch

    head = AuxiliaryHeadCIFARPallas(C, num_classes, kp)

    out = jax.block_until_ready(head(x))
    assert out.shape == (N, num_classes), out.shape

    ref = jax.block_until_ready(head.reference(x))
    np.testing.assert_allclose(np.asarray(out), np.asarray(ref), atol=1e-4, rtol=1e-4)

    print("KERNEL_OK")
</pallas_src>

<mosaic_0001>
module attributes {stable_mosaic.version = 11 : i64} {
  func.func @_aux_head_kernel(%arg0: i32, %arg1: memref<1x8x8x64xf32, #tpu.memory_space<vmem>>, %arg2: memref<64x128xf32, #tpu.memory_space<vmem>>, %arg3: memref<1x128xf32, #tpu.memory_space<vmem>>, %arg4: memref<4x128x768xf32, #tpu.memory_space<vmem>>, %arg5: memref<1x768xf32, #tpu.memory_space<vmem>>, %arg6: memref<768x10xf32, #tpu.memory_space<vmem>>, %arg7: memref<1x10xf32, #tpu.memory_space<vmem>>, %arg8: memref<1x1x10xf32, #tpu.memory_space<vmem>>) attributes {dimension_semantics = [#tpu.dimension_semantics<parallel>], iteration_bounds = array<i64: 2>, scalar_prefetch = 0 : i64, scratch_operands = 0 : i64, tpu.core_type = #tpu.core_type<tc>, window_params = [{transform_indices = @transform_0, window_bounds = array<i64: 1, 8, 8, 64>}, {pipeline_mode = #tpu.pipeline_mode<synchronous>, transform_indices = @transform_1, window_bounds = array<i64: 64, 128>}, {pipeline_mode = #tpu.pipeline_mode<synchronous>, transform_indices = @transform_2, window_bounds = array<i64: 1, 128>}, {pipeline_mode = #tpu.pipeline_mode<synchronous>, transform_indices = @transform_3, window_bounds = array<i64: 4, 128, 768>}, {pipeline_mode = #tpu.pipeline_mode<synchronous>, transform_indices = @transform_4, window_bounds = array<i64: 1, 768>}, {pipeline_mode = #tpu.pipeline_mode<synchronous>, transform_indices = @transform_5, window_bounds = array<i64: 768, 10>}, {pipeline_mode = #tpu.pipeline_mode<synchronous>, transform_indices = @transform_6, window_bounds = array<i64: 1, 10>}, {transform_indices = @transform_7, window_bounds = array<i64: 1, 1, 10>}]} {
    %c0 = arith.constant 0 : index
    %c0_0 = arith.constant 0 : index
    %c0_1 = arith.constant 0 : index
    %c0_2 = arith.constant 0 : index
    %0 = vector.load %arg1[%c0, %c0_0, %c0_1, %c0_2] : memref<1x8x8x64xf32, #tpu.memory_space<vmem>>, vector<1x8x8x64xf32>
    %1 = vector.shape_cast %0 : vector<1x8x8x64xf32> to vector<8x8x64xf32>
    %cst = arith.constant 0.000000e+00 : f32
    %2 = vector.broadcast %cst : f32 to vector<8x8x64xf32>
    %3 = arith.maximumf %1, %2 : vector<8x8x64xf32>
    %4 = vector.extract_strided_slice %3 {offsets = [0, 0, 0], sizes = [5, 5, 64], strides = [1, 1, 1]} : vector<8x8x64xf32> to vector<5x5x64xf32>
    %cst_3 = arith.constant dense<0.000000e+00> : vector<5x64xf32>
    %5 = vector.multi_reduction <add>, %4, %cst_3 [0] : vector<5x5x64xf32> to vector<5x64xf32>
    %cst_4 = arith.constant dense<0.000000e+00> : vector<64xf32>
    %6 = vector.multi_reduction <add>, %5, %cst_4 [0] : vector<5x64xf32> to vector<64xf32>
    %7 = vector.shape_cast %6 : vector<64xf32> to vector<1x64xf32>
    %cst_5 = arith.constant 4.000000e-02 : f32
    %8 = vector.broadcast %cst_5 : f32 to vector<1x64xf32>
    %9 = arith.mulf %7, %8 : vector<1x64xf32>
    %10 = vector.extract_strided_slice %3 {offsets = [0, 3, 0], sizes = [5, 5, 64], strides = [1, 1, 1]} : vector<8x8x64xf32> to vector<5x5x64xf32>
    %cst_6 = arith.constant dense<0.000000e+00> : vector<5x64xf32>
    %11 = vector.multi_reduction <add>, %10, %cst_6 [0] : vector<5x5x64xf32> to vector<5x64xf32>
    %cst_7 = arith.constant dense<0.000000e+00> : vector<64xf32>
    %12 = vector.multi_reduction <add>, %11, %cst_7 [0] : vector<5x64xf32> to vector<64xf32>
    %13 = vector.shape_cast %12 : vector<64xf32> to vector<1x64xf32>
    %cst_8 = arith.constant 4.000000e-02 : f32
    %14 = vector.broadcast %cst_8 : f32 to vector<1x64xf32>
    %15 = arith.mulf %13, %14 : vector<1x64xf32>
    %16 = vector.extract_strided_slice %3 {offsets = [3, 0, 0], sizes = [5, 5, 64], strides = [1, 1, 1]} : vector<8x8x64xf32> to vector<5x5x64xf32>
    %cst_9 = arith.constant dense<0.000000e+00> : vector<5x64xf32>
    %17 = vector.multi_reduction <add>, %16, %cst_9 [0] : vector<5x5x64xf32> to vector<5x64xf32>
    %cst_10 = arith.constant dense<0.000000e+00> : vector<64xf32>
    %18 = vector.multi_reduction <add>, %17, %cst_10 [0] : vector<5x64xf32> to vector<64xf32>
    %19 = vector.shape_cast %18 : vector<64xf32> to vector<1x64xf32>
    %cst_11 = arith.constant 4.000000e-02 : f32
    %20 = vector.broadcast %cst_11 : f32 to vector<1x64xf32>
    %21 = arith.mulf %19, %20 : vector<1x64xf32>
    %22 = vector.extract_strided_slice %3 {offsets = [3, 3, 0], sizes = [5, 5, 64], strides = [1, 1, 1]} : vector<8x8x64xf32> to vector<5x5x64xf32>
    %cst_12 = arith.constant dense<0.000000e+00> : vector<5x64xf32>
    %23 = vector.multi_reduction <add>, %22, %cst_12 [0] : vector<5x5x64xf32> to vector<5x64xf32>
    %cst_13 = arith.constant dense<0.000000e+00> : vector<64xf32>
    %24 = vector.multi_reduction <add>, %23, %cst_13 [0] : vector<5x64xf32> to vector<64xf32>
    %25 = vector.shape_cast %24 : vector<64xf32> to vector<1x64xf32>
    %cst_14 = arith.constant 4.000000e-02 : f32
    %26 = vector.broadcast %cst_14 : f32 to vector<1x64xf32>
    %27 = arith.mulf %25, %26 : vector<1x64xf32>
    %28 = tpu.concatenate %9, %15, %21, %27 in 0 : vector<1x64xf32>, vector<1x64xf32>, vector<1x64xf32>, vector<1x64xf32> -> vector<4x64xf32>
    %c0_15 = arith.constant 0 : index
    %c0_16 = arith.constant 0 : index
    %29 = vector.load %arg2[%c0_15, %c0_16] : memref<64x128xf32, #tpu.memory_space<vmem>>, vector<64x128xf32>
    %cst_17 = arith.constant dense<0.000000e+00> : vector<4x128xf32>
    %30 = tpu.matmul %28, %29, %cst_17 {dimension_numbers = #tpu.dot_dimension_numbers<[1], [0], [0], [1], [0, 0, 1, 1], [], []>} : vector<4x64xf32>, vector<64x128xf32>, vector<4x128xf32> -> vector<4x128xf32>
    %c0_18 = arith.constant 0 : index
    %c0_19 = arith.constant 0 : index
    %31 = vector.load %arg3[%c0_18, %c0_19] : memref<1x128xf32, #tpu.memory_space<vmem>>, vector<1x128xf32>
    %32 = vector.broadcast %31 : vector<1x128xf32> to vector<4x128xf32>
    %33 = arith.addf %30, %32 : vector<4x128xf32>
    %cst_20 = arith.constant 0.000000e+00 : f32
    %34 = vector.broadcast %cst_20 : f32 to vector<4x128xf32>
    %35 = arith.maximumf %33, %34 : vector<4x128xf32>
    %36 = vector.extract_strided_slice %35 {offsets = [0, 0], sizes = [1, 128], strides = [1, 1]} : vector<4x128xf32> to vector<1x128xf32>
    %c0_21 = arith.constant 0 : index
    %c0_22 = arith.constant 0 : index
    %c0_23 = arith.constant 0 : index
    %37 = vector.load %arg4[%c0_21, %c0_22, %c0_23] : memref<4x128x768xf32, #tpu.memory_space<vmem>>, vector<1x128x768xf32>
    %38 = vector.shape_cast %37 : vector<1x128x768xf32> to vector<128x768xf32>
    %cst_24 = arith.constant dense<0.000000e+00> : vector<1x768xf32>
    %39 = tpu.matmul %36, %38, %cst_24 {dimension_numbers = #tpu.dot_dimension_numbers<[1], [0], [0], [1], [0, 0, 1, 1], [], []>} : vector<1x128xf32>, vector<128x768xf32>, vector<1x768xf32> -> vector<1x768xf32>
    %40 = vector.extract_strided_slice %35 {offsets = [1, 0], sizes = [1, 128], strides = [1, 1]} : vector<4x128xf32> to vector<1x128xf32>
    %c1 = arith.constant 1 : index
    %c0_25 = arith.constant 0 : index
    %c0_26 = arith.constant 0 : index
    %41 = vector.load %arg4[%c1, %c0_25, %c0_26] : memref<4x128x768xf32, #tpu.memory_space<vmem>>, vector<1x128x768xf32>
    %42 = vector.shape_cast %41 : vector<1x128x768xf32> to vector<128x768xf32>
    %cst_27 = arith.constant dense<0.000000e+00> : vector<1x768xf32>
    %43 = tpu.matmul %40, %42, %cst_27 {dimension_numbers = #tpu.dot_dimension_numbers<[1], [0], [0], [1], [0, 0, 1, 1], [], []>} : vector<1x128xf32>, vector<128x768xf32>, vector<1x768xf32> -> vector<1x768xf32>
    %44 = arith.addf %39, %43 : vector<1x768xf32>
    %45 = vector.extract_strided_slice %35 {offsets = [2, 0], sizes = [1, 128], strides = [1, 1]} : vector<4x128xf32> to vector<1x128xf32>
    %c2 = arith.constant 2 : index
    %c0_28 = arith.constant 0 : index
    %c0_29 = arith.constant 0 : index
    %46 = vector.load %arg4[%c2, %c0_28, %c0_29] : memref<4x128x768xf32, #tpu.memory_space<vmem>>, vector<1x128x768xf32>
    %47 = vector.shape_cast %46 : vector<1x128x768xf32> to vector<128x768xf32>
    %cst_30 = arith.constant dense<0.000000e+00> : vector<1x768xf32>
    %48 = tpu.matmul %45, %47, %cst_30 {dimension_numbers = #tpu.dot_dimension_numbers<[1], [0], [0], [1], [0, 0, 1, 1], [], []>} : vector<1x128xf32>, vector<128x768xf32>, vector<1x768xf32> -> vector<1x768xf32>
    %49 = arith.addf %44, %48 : vector<1x768xf32>
    %50 = vector.extract_strided_slice %35 {offsets = [3, 0], sizes = [1, 128], strides = [1, 1]} : vector<4x128xf32> to vector<1x128xf32>
    %c3 = arith.constant 3 : index
    %c0_31 = arith.constant 0 : index
    %c0_32 = arith.constant 0 : index
    %51 = vector.load %arg4[%c3, %c0_31, %c0_32] : memref<4x128x768xf32, #tpu.memory_space<vmem>>, vector<1x128x768xf32>
    %52 = vector.shape_cast %51 : vector<1x128x768xf32> to vector<128x768xf32>
    %cst_33 = arith.constant dense<0.000000e+00> : vector<1x768xf32>
    %53 = tpu.matmul %50, %52, %cst_33 {dimension_numbers = #tpu.dot_dimension_numbers<[1], [0], [0], [1], [0, 0, 1, 1], [], []>} : vector<1x128xf32>, vector<128x768xf32>, vector<1x768xf32> -> vector<1x768xf32>
    %54 = arith.addf %49, %53 : vector<1x768xf32>
    %c0_34 = arith.constant 0 : index
    %c0_35 = arith.constant 0 : index
    %55 = vector.load %arg5[%c0_34, %c0_35] : memref<1x768xf32, #tpu.memory_space<vmem>>, vector<1x768xf32>
    %56 = arith.addf %54, %55 : vector<1x768xf32>
    %cst_36 = arith.constant 0.000000e+00 : f32
    %57 = vector.broadcast %cst_36 : f32 to vector<1x768xf32>
    %58 = arith.maximumf %56, %57 : vector<1x768xf32>
    %c0_37 = arith.constant 0 : index
    %c0_38 = arith.constant 0 : index
    %59 = vector.load %arg6[%c0_37, %c0_38] : memref<768x10xf32, #tpu.memory_space<vmem>>, vector<768x10xf32>
    %cst_39 = arith.constant dense<0.000000e+00> : vector<1x10xf32>
    %60 = tpu.matmul %58, %59, %cst_39 {dimension_numbers = #tpu.dot_dimension_numbers<[1], [0], [0], [1], [0, 0, 1, 1], [], []>} : vector<1x768xf32>, vector<768x10xf32>, vector<1x10xf32> -> vector<1x10xf32>
    %c0_40 = arith.constant 0 : index
    %c0_41 = arith.constant 0 : index
    %61 = vector.load %arg7[%c0_40, %c0_41] : memref<1x10xf32, #tpu.memory_space<vmem>>, vector<1x10xf32>
    %62 = arith.addf %60, %61 : vector<1x10xf32>
    %c0_42 = arith.constant 0 : index
    %c0_43 = arith.constant 0 : index
    %c0_44 = arith.constant 0 : index
    %63 = vector.load %arg8[%c0_42, %c0_43, %c0_44] : memref<1x1x10xf32, #tpu.memory_space<vmem>>, vector<1x1x10xf32>
    %64 = vector.shape_cast %63 : vector<1x1x10xf32> to vector<1x10xf32>
    %65 = vector.shape_cast %62 : vector<1x10xf32> to vector<1x1x10xf32>
    tpu.vector_store %arg8[%c0_42, %c0_43, %c0_44], %65 {strides = array<i32>} : memref<1x1x10xf32, #tpu.memory_space<vmem>>, vector<1x1x10xf32>,
    return
  }
  func.func @transform_0(%arg0: i32) -> (i32, i32, i32, i32) {
    %c0_i32 = arith.constant 0 : i32
    %c0_i32_0 = arith.constant 0 : i32
    %c0_i32_1 = arith.constant 0 : i32
    %c0_i32_2 = arith.constant 0 : i32
    return %arg0, %c0_i32, %c0_i32_0, %c0_i32_1 : i32, i32, i32, i32
  }
  func.func @transform_1(%arg0: i32) -> (i32, i32) {
    %c0_i32 = arith.constant 0 : i32
    %c0_i32_0 = arith.constant 0 : i32
    %c0_i32_1 = arith.constant 0 : i32
    return %c0_i32, %c0_i32_0 : i32, i32
  }
  func.func @transform_2(%arg0: i32) -> (i32, i32) {
    %c0_i32 = arith.constant 0 : i32
    %c0_i32_0 = arith.constant 0 : i32
    %c0_i32_1 = arith.constant 0 : i32
    return %c0_i32, %c0_i32_0 : i32, i32
  }
  func.func @transform_3(%arg0: i32) -> (i32, i32, i32) {
    %c0_i32 = arith.constant 0 : i32
    %c0_i32_0 = arith.constant 0 : i32
    %c0_i32_1 = arith.constant 0 : i32
    %c0_i32_2 = arith.constant 0 : i32
    return %c0_i32, %c0_i32_0, %c0_i32_1 : i32, i32, i32
  }
  func.func @transform_4(%arg0: i32) -> (i32, i32) {
    %c0_i32 = arith.constant 0 : i32
    %c0_i32_0 = arith.constant 0 : i32
    %c0_i32_1 = arith.constant 0 : i32
    return %c0_i32, %c0_i32_0 : i32, i32
  }
  func.func @transform_5(%arg0: i32) -> (i32, i32) {
    %c0_i32 = arith.constant 0 : i32
    %c0_i32_0 = arith.constant 0 : i32
    %c0_i32_1 = arith.constant 0 : i32
    return %c0_i32, %c0_i32_0 : i32, i32
  }
  func.func @transform_6(%arg0: i32) -> (i32, i32) {
    %c0_i32 = arith.constant 0 : i32
    %c0_i32_0 = arith.constant 0 : i32
    %c0_i32_1 = arith.constant 0 : i32
    return %c0_i32, %c0_i32_0 : i32, i32
  }
  func.func @transform_7(%arg0: i32) -> (i32, i32, i32) {
    %c0_i32 = arith.constant 0 : i32
    %c0_i32_0 = arith.constant 0 : i32
    %c0_i32_1 = arith.constant 0 : i32
    return %arg0, %c0_i32, %c0_i32_0 : i32, i32, i32
  }
}

</mosaic_0001>

<bundles_post_ra>
// kernel: tpu_custom_call.1
= control target key start
LH: loop header
LB: loop body
LE: loop exit
PB: predicated region body
PF: predicated region fallthrough
CT: control target
= control target key end

     0   :  { %12 = vsyncpa [#allocation3], 0  ;;  %s4043_s0 = inlined_call_operand.hbm [shape: f32[2,8,8,64], index: 0, kind: input, shape index: {}]   ;;  %s4044_s1 = inlined_call_operand.hbm [shape: f32[64,128], index: 1, kind: input, shape index: {}]   ;;  %s4045_s2 = inlined_call_operand.hbm [shape: f32[1,128], index: 2, kind: input, shape index: {}]   ;;  %s4046_s3 = inlined_call_operand.hbm [shape: f32[4,128,768], index: 3, kind: input, shape index: {}]   ;;  %s4047_s4 = inlined_call_operand.hbm [shape: f32[1,768], index: 4, kind: input, shape index: {}]   ;;  %s4048_s5 = inlined_call_operand.vmem [shape: f32[768,10], index: 5, kind: input, shape index: {}]   ;;  %s4049_s6 = inlined_call_operand.hbm [shape: f32[1,10], index: 6, kind: input, shape index: {}]   ;;  %s4050_s7 = inlined_call_operand.hbm [shape: f32[2,1,10], index: 7, kind: output, shape index: {}]  }
   0x1   :  { %14 = vsyncpa [#allocation3 + $0x1], 0 }
   0x2   :  { %15 = vsyncpa [#allocation6], 0 }
   0x3   :  { %16 = vsyncpa [#allocation9], 0 }
   0x4   :  { %17 = vsyncpa [#allocation12], 0 }
   0x5   :  { %18 = vsyncpa [#allocation4], 0 }
   0x6   :  { %20 = vsyncpa [#allocation4 + $0x1], 0  ;;  %s3360_s24 = smov 0   ;;  %s3362_s25 = smov 0  }
   0x7   :  { %s3364_s26 = smov 0   ;;  %s3366_s27 = smov 0  }
   0x8 LB: > { %s3306_s28 = smov [#allocation5]   ;;  %s3381_s30 = sadd.s32 4294967295, %s3304_s27   ;;  %s3304_s27 = sphi %s3366_s27, %s4077_s27   ;;  %s3300_s26 = sphi %s3364_s26, %s4076_s26   ;;  %s3296_s25 = sphi %s3362_s25, %s4075_s25   ;;  %s3292_s24 = sphi %s3360_s24, %s4074_s24  }
   0x9   : > { %s221_s29 = sshll.u32 %s3306_s28, 4  ;;  %p2286_p0 = scmp.ge.s32.totalorder %s3304_s27, 1  ;;  %s3386_s29 = int_to_ptr.vmem [resolvable:$true] %s221_s29 }
   0xa   : > { %p4051_p1 = scmp.eq.s32.totalorder %s3381_s30, 0  ;;  %p209_p2 = scmp.lt.s32.totalorder %s3304_s27, 3 }
   0xb   : > { %s3307_s9 = smov [#allocation8]   ;;  %s3308_s12 = smov [#allocation7]  }
   0xc   : > { %p3388_p3 = pnand %p2286_p0, %p209_p2  ;;  %s245_s10 = sshll.u32 %s3307_s9, 4  ;;  %s3401_s10 = int_to_ptr.vmem [resolvable:$true] %s245_s10 }
   0xd   : > { %s3403_s13 = sshll.u32 %s3308_s12, 4  ;;  %s3056_s16 = scalar_lea.hbm %s4044_s1, 1024  ;;  %s236_s13 = int_to_ptr.vmem [resolvable:$true] %s3403_s13 }
   0xe   : > { %s4055_s8 = scalar_select %p3388_p3, 1, 0 }
   0xf   : > { %p2976_p5 = pneg %p3388_p3  ;;  %p3057_p7 = scmp.ne.s32.totalorder %s4044_s1, %s3056_s16 }
  0x10   : > { %p3063_p11 = scmp.lt.u32.totalorder %s3056_s16, %s4044_s1 }
  0x11   : > { %p3397_p6 = pnand %p2976_p5, %p4051_p1 }
  0x13   : > { %p3413_p8 = pneg %p3397_p6 }
  0x15   : > { %p3059_p9 = pnand %p3413_p8, %p3057_p7 }
  0x17   : > { %p3060_p10 = pneg %p3059_p9 }
  0x19   : > { %p3065_p12 = pnand %p3063_p11, %p3060_p10 }
  0x1b   : > { %3068 = shalt.err (!%p3065_p12)
}
  0x1c   : > { %s3069_s22 = scalar_lea.vmem %s3386_s29, 1024  ;;  %p3077_p5 = scmp.lt.s32.totalorder %s3386_s29, %s3386_s29 }
  0x1d   : > { %p3070_p13 = scmp.ne.s32.totalorder %s3386_s29, %s3069_s22  ;;  %p3078_p4 = scmp.lt.s32.totalorder %s3069_s22, %s3069_s22 }
  0x1f   : > { %p3072_p0 = pnand %p3070_p13, %p3413_p8  ;;  %p3079_p7 = por %p3078_p4, %p3077_p5 }
  0x21   : > { %p3073_p2 = pneg %p3072_p0 }
  0x23   : > { %p3080_p9 = pnand %p3079_p7, %p3073_p2 }
  0x25   : > { %3083 = shalt.err (!%p3080_p9)
}
  0x26   : > { %s4053_s23 = smov 128   ;;  %s3310_s28 = smov 8  }
  0x27   : > { %2979 = dma.hbm_to_vmem [thread:$0]  (!%p3397_p6), %s4044_s1, 1024, %s3386_s29, [#allocation6], %s4053_s23, %s4053_s23, %s3310_s28  }
  0x28   : > { %s3084_s16 = scalar_lea.hbm %s4046_s3, 49152 }
  0x29   : > { %p3085_p4 = scmp.ne.s32.totalorder %s4046_s3, %s3084_s16  ;;  %p3091_p12 = scmp.lt.u32.totalorder %s3084_s16, %s4046_s3 }
  0x2b   : > { %p3087_p10 = pnand %p3085_p4, %p3413_p8 }
  0x2d   : > { %p3088_p11 = pneg %p3087_p10 }
  0x2f   : > { %p3093_p13 = pnand %p3091_p12, %p3088_p11 }
  0x31   : > { %3096 = shalt.err (!%p3093_p13)
}
  0x32   : > { %s3097_s29 = scalar_lea.vmem %s3401_s10, 49152  ;;  %p3105_p7 = scmp.lt.s32.totalorder %s3401_s10, %s3401_s10 }
  0x33   : > { %p3098_p0 = scmp.ne.s32.totalorder %s3401_s10, %s3097_s29  ;;  %p3106_p9 = scmp.lt.s32.totalorder %s3097_s29, %s3097_s29 }
  0x35   : > { %p3100_p2 = pnand %p3098_p0, %p3413_p8  ;;  %p3107_p4 = por %p3106_p9, %p3105_p7 }
  0x37   : > { %p3101_p5 = pneg %p3100_p2 }
  0x39   : > { %p3108_p10 = pnand %p3107_p4, %p3101_p5 }
  0x3b   : > { %3111 = shalt.err (!%p3108_p10)
}
  0x3c   : > { %s3311_s22 = smov 768   ;;  %s3312_s9 = smov 48  }
  0x3d   : > { %2985 = dma.hbm_to_vmem [thread:$0]  (!%p3397_p6), %s4046_s3, 49152, %s3401_s10, [#allocation9], %s3311_s22, %s3311_s22, %s3312_s9  }
  0x3e   : > { %s3112_s17 = scalar_lea.hbm %s4045_s2, 16 }
  0x3f   : > { %p3113_p11 = scmp.ne.s32.totalorder %s4045_s2, %s3112_s17  ;;  %p3119_p0 = scmp.lt.u32.totalorder %s3112_s17, %s4045_s2 }
  0x41   : > { %p3115_p12 = pnand %p3113_p11, %p3413_p8 }
  0x43   : > { %p3116_p13 = pneg %p3115_p12 }
  0x45   : > { %p3121_p2 = pnand %p3119_p0, %p3116_p13 }
  0x47   : > { %3124 = shalt.err (!%p3121_p2)
}
  0x48   : > { %s3125_s12 = scalar_lea.vmem %s236_s13, 16  ;;  %s3132_s10 = scalar_lea.vmem %s236_s13, 32 }
  0x49   : > { %p3126_p5 = scmp.ne.s32.totalorder %s236_s13, %s3125_s12  ;;  %p3133_p4 = scmp.lt.s32.totalorder %s236_s13, %s236_s13 }
  0x4a   : > { %p3134_p10 = scmp.lt.s32.totalorder %s3132_s10, %s3125_s12 }
  0x4b   : > { %p3128_p7 = pnand %p3126_p5, %p3413_p8 }
  0x4c   : > { %p3135_p1 = por %p3134_p10, %p3133_p4 }
  0x4d   : > { %p3129_p9 = pneg %p3128_p7 }
  0x4f   : > { %p3136_p3 = pnand %p3135_p1, %p3129_p9 }
  0x51   : > { %3139 = shalt.err (!%p3136_p3)
}
  0x52   : > { %2982 = dma.hbm_to_vmem [thread:$0]  (!%p3397_p6), %s4045_s2, 16, %s236_s13, [#allocation6]  }
  0x53   : > { %s3313_s14 = smov [#allocation10]   ;;  %s3314_s16 = smov [#allocation11]  }
  0x54   : > { %s259_s15 = sshll.u32 %s3313_s14, 4  ;;  %s273_s17 = sshll.u32 %s3314_s16, 4  ;;  %s260_s15 = int_to_ptr.vmem [resolvable:$true] %s259_s15  ;;  %s274_s17 = int_to_ptr.vmem [resolvable:$true] %s273_s17 }
  0x55   : > { %s3140_s21 = scalar_lea.hbm %s4047_s4, 96 }
  0x56   : > { %p3141_p1 = scmp.ne.s32.totalorder %s4047_s4, %s3140_s21  ;;  %p3147_p12 = scmp.lt.u32.totalorder %s3140_s21, %s4047_s4 }
  0x58   : > { %p3143_p3 = pnand %p3141_p1, %p3413_p8 }
  0x5a   : > { %p3144_p11 = pneg %p3143_p3 }
  0x5c   : > { %p3149_p13 = pnand %p3147_p12, %p3144_p11 }
  0x5e   : > { %3152 = shalt.err (!%p3149_p13)
}
  0x5f   : > { %s3153_s13 = scalar_lea.vmem %s260_s15, 96  ;;  %p3161_p7 = scmp.lt.s32.totalorder %s260_s15, %s260_s15 }
  0x60   : > { %p3154_p0 = scmp.ne.s32.totalorder %s260_s15, %s3153_s13  ;;  %p3162_p9 = scmp.lt.s32.totalorder %s3153_s13, %s3153_s13 }
  0x62   : > { %p3156_p2 = pnand %p3154_p0, %p3413_p8  ;;  %p3163_p4 = por %p3162_p9, %p3161_p7 }
  0x64   : > { %p3157_p5 = pneg %p3156_p2 }
  0x66   : > { %p3164_p10 = pnand %p3163_p4, %p3157_p5 }
  0x68   : > { %3167 = shalt.err (!%p3164_p10)
}
  0x69   : > { %2988 = dma.hbm_to_vmem [thread:$0]  (!%p3397_p6), %s4047_s4, 96, %s260_s15, [#allocation9]  }
  0x6a   : > { %s3168_s20 = scalar_lea.hbm %s4049_s6, 16 }
  0x6b   : > { %p3169_p1 = scmp.ne.s32.totalorder %s4049_s6, %s3168_s20  ;;  %p3175_p12 = scmp.lt.u32.totalorder %s3168_s20, %s4049_s6 }
  0x6d   : > { %p3171_p3 = pnand %p3169_p1, %p3413_p8 }
  0x6f   : > { %p3172_p11 = pneg %p3171_p3 }
  0x71   : > { %p3177_p13 = pnand %p3175_p12, %p3172_p11 }
  0x73   : > { %3180 = shalt.err (!%p3177_p13)
}
  0x74   : > { %s3181_s22 = scalar_lea.vmem %s274_s17, 16  ;;  %s3188_s15 = scalar_lea.vmem %s274_s17, 32 }
  0x75   : > { %p3182_p0 = scmp.ne.s32.totalorder %s274_s17, %s3181_s22  ;;  %p3189_p7 = scmp.lt.s32.totalorder %s274_s17, %s274_s17 }
  0x76   : > { %p3190_p9 = scmp.lt.s32.totalorder %s3188_s15, %s3181_s22 }
  0x77   : > { %p3184_p2 = pnand %p3182_p0, %p3413_p8 }
  0x78   : > { %p3191_p4 = por %p3190_p9, %p3189_p7 }
  0x79   : > { %p3185_p5 = pneg %p3184_p2 }
  0x7b   : > { %p3192_p10 = pnand %p3191_p4, %p3185_p5 }
  0x7d   : > { %3195 = shalt.err (!%p3192_p10)
}
  0x7e   : > { %2991 = dma.hbm_to_vmem [thread:$0]  (!%p3397_p6), %s4049_s6, 16, %s274_s17, [#allocation12]  }
  0x7f   : > { %s2285_s19 = sadd.s32 4294967294, %s3304_s27   ;;  %s3517_s11 = sadd.s32 1, %s3304_s27  }
  0x80   : > { %s33_s14 = sadd.s32 1, %s3300_s26  ;;  %s30_s16 = ssub.s32 %s3304_s27, %s3517_s11 }
  0x81   : > { %p40_p8 = scmp.ne.s32.totalorder %s3300_s26, %s3296_s25  ;;  %p31_p1 = scmp.eq.s32.totalorder %s30_s16, 0 }
  0x82   : > { %p41_p3 = scmp.eq.s32.totalorder %s3304_s27, 0  ;;  %p46_p11 = scmp.ne.s32.totalorder %s3296_s25, %s3292_s24 }
  0x83   : > { %p196_p12 = scmp.eq.s32.totalorder %s3381_s30, 1  ;;  %p4058_p0 = scmp.eq.s32.totalorder %s3381_s30, 0 }
  0x84   : > { %s3529_s18 = scalar_select %p31_p1, %s3300_s26, %s33_s14  }
  0x85   : > { %p42_p13 = por %p41_p3, %p40_p8  ;;  %p3533_p2 = por %p4058_p0, %p46_p11 }
  0x86   : > { %p3537_p6 = por %p196_p12, %p40_p8  ;;  %p202_p5 = scmp.eq.s32.totalorder %s2285_s19, 1 }
  0x87   : > { %p3005_p7 = scmp.lt.s32.totalorder %s3304_s27, 2  ;;  %s284_s21 = sand.u32 1, %s3300_s26  }
  0x88   : > { %s4060_s17 = scalar_select %p3537_p6, 1, 0 }
  0x89   : > { %p3543_p9 = por %p202_p5, %p46_p11  ;;  %s2293_s12 = sshll.u32 %s284_s21, 6 }
  0x8a   : > { %s2308_s10 = sshll.u32 %s3304_s27, 10  ;;  %s288_s9 = scalar_lea.vmem [#allocation2], %s2293_s12 }
  0x8b   : > { %s4061_s29 = scalar_select %p3543_p9, 1, 0 }
  0x8c   : > { %s3551_s13 = scalar_lea.hbm %s4043_s0, %s2308_s10  ;;  %s295_s14 = sshll.u32 %s288_s9, 4  ;;  %s3557_s14 = int_to_ptr.vmem [resolvable:$true] %s295_s14 }
  0x8d   : > { %p3553_p4 = pnand %p3005_p7, %p42_p13  ;;  %s3559_s16 = scalar_lea.sflag [#allocation3], %s284_s21 }
  0x8e   : > { %s3196_s23 = scalar_lea.hbm %s3551_s13, 1024  ;;  %s3201_s22 = scalar_lea.hbm %s4043_s0, 2048 }
  0x8f   : > { %p3197_p10 = scmp.ne.s32.totalorder %s3551_s13, %s3196_s23  ;;  %p3198_p8 = pneg %p3553_p4 }
  0x90   : > { %p3202_p11 = scmp.lt.u32.totalorder %s3551_s13, %s4043_s0  ;;  %p3203_p12 = scmp.lt.u32.totalorder %s3201_s22, %s3196_s23 }
  0x91   : > { %p3199_p1 = pnand %p3198_p8, %p3197_p10  ;;  %p3205_p0 = scmp.lt.u32.totalorder %s3196_s23, %s3551_s13 }
  0x92   : > { %p3204_p13 = por %p3203_p12, %p3202_p11 }
  0x93   : > { %p3200_p3 = pneg %p3199_p1 }
  0x94   : > { %p3206_p5 = por %p3205_p0, %p3204_p13 }
  0x96   : > { %p3207_p7 = pnand %p3206_p5, %p3200_p3 }
  0x98   : > { %3210 = shalt.err (!%p3207_p7)
}
  0x99   : > { %s3211_s21 = scalar_lea.vmem %s3557_s14, 1024  ;;  %s3315_s12 = smov [#allocation2]  }
  0x9a   : > { %p3212_p10 = scmp.ne.s32.totalorder %s3557_s14, %s3211_s21  ;;  %s3216_s10 = sshll.u32 %s3315_s12, 4  ;;  %s3217_s10 = int_to_ptr.vmem [resolvable:$false] %s3216_s10 }
  0x9b   : > { %s3218_s15 = scalar_lea.vmem %s3217_s10, 2048  ;;  %p3219_p6 = scmp.lt.s32.totalorder %s3557_s14, %s3217_s10 }
  0x9c   : > { %p3214_p1 = pnand %p3212_p10, %p3198_p8  ;;  %p3220_p11 = scmp.lt.s32.totalorder %s3218_s15, %s3211_s21 }
  0x9e   : > { %p3215_p9 = pneg %p3214_p1  ;;  %p3221_p12 = por %p3220_p11, %p3219_p6 }
  0xa0   : > { %p3222_p13 = pnand %p3221_p12, %p3215_p9 }
  0xa2   : > { %3225 = shalt.err (!%p3222_p13)
}
  0xa3   : > { %s4063_s23 = smov 128   ;;  %p4064_p8 = scmp.ne.s32.totalorder %s4055_s8, 0 }
  0xa4   : > { %2995 = dma.hbm_to_vmem [thread:$0]  (!%p3553_p4), %s3551_s13, 1024, %s3557_s14, %s3559_s16, %s4063_s23, %s4063_s23, %s3310_s28  }
  0xa5   : > { %307 = sbr.rel (%p4064_p8) target bundleno = 1142 (0x476), region = 48  ;;  %s3593_s22 = sand.u32 (!%p4064_p8), 1, %s3296_s25  }
  0xa6   : > { %s2297_s9 = sshll.u32 (!%p4064_p8), %s3593_s22, 6  ;;  %s310_s21 = scalar_lea.sflag (!%p4064_p8), [#allocation3], %s3593_s22 }
  0xa7   : > { %s3597_s12 = scalar_lea.vmem (!%p4064_p8), [#allocation2], %s2297_s9 }
  0xac   : > { %3271 = dma.done.wait (%p3533_p2), %s310_s21, 1024  }
  0xad   : > { %3273 = vsyncadd (%p3533_p2), %s310_s21, 4294966272  ;;  %p4065_p6 = scmp.eq.s32.totalorder %s3381_s30, 0 }
  0xaf   : > { %3275 = dma.done.wait (%p4065_p6), [#allocation6], 1040   ;;  %p4066_p9 = pmov %p4065_p6 }
  0xb0   : > { %p4067_p4 = pmov %p4065_p6 }
  0xb1   : > { %3277 = vsyncadd (%p4066_p9), [#allocation6], 4294966256 }
  0xb2   : > { %3279 = dma.done.wait (%p4067_p4), [#allocation9], 49248   ;;  %p4068_p3 = pmov %p4067_p4 }
  0xb4   : > { %3281 = vsyncadd (%p4068_p3), [#allocation9], 4294918048  ;;  %p4069_p0 = pmov %p4068_p3 }
  0xb6   : > { %3283 = dma.done.wait (%p4069_p0), [#allocation12], 16   ;;  %p4070_p5 = pmov %p4069_p0 }
  0xb7   : > { %v3316_v0 = vmov 0.0|0.0   ;;  %vm3317_vm0 = vmmov 0   ;;  %v3318_v1 = vmov 0.0   ;;  %v457_v2 = vld [vmem:[#allocation5] sm:$0xff]  ;;  %v458_v3 = vld [vmem:[#allocation5 + $0x8] sm:$0xff]  ;;  %v459_v4 = vld [vmem:[#allocation5 + $0x10] sm:$0xff] }
  0xb8   : > { %3285 = vsyncadd (%p4070_p5), [#allocation12], 4294967280  ;;  %2442 = vmatprep.subr.bf16.mxu0 %v3316_v0  ;;  %2439 = vmatprep.mubr.msk.f32.mxu0 %vm3317_vm0, %v3318_v1  ;;  %v2443_v5 = vpack.c.bf16 %v458_v3, %v457_v2  ;;  %v460_v6 = vld [vmem:[#allocation5 + $0x18] sm:$0xff]  ;;  %v461_v7 = vld [vmem:[#allocation5 + $0x20] sm:$0xff]  ;;  %vm379_vm1 = vcmask 520192   ;;  %vm397_vm2 = vcmask 523267  }
  0xb9   : > { %807 = vmatprep.mubr.f32.mxu1 %v3318_v1  ;;  %v462_v8 = vld [vmem:[#allocation5 + $0x28] sm:$0xff]  ;;  %v363_v9 = vld [vmem:[%s3597_s12] sm:$0xff]  ;;  %v2446_v10 = vpack.c.bf16 %v460_v6, %v459_v4  ;;  %v365_v12 = vld [vmem:[%s3597_s12 + $0x10] sm:$0xff]  ;;  %vm451_vm3 = vcmask 1040384   ;;  %vm453_vm4 = vcmask 1041408   ;;  %vm455_vm5 = vcmask 1042432  }
  0xba   : > { %2444 = vmatpush3.bf16.msra.mxu0 %v2443_v5  ;;  %v364_v11 = vld [vmem:[%s3597_s12 + $0x8] sm:$0xff]  ;;  %v366_v13 = vld [vmem:[%s3597_s12 + $0x18] sm:$0xff]  ;;  %v371_v14 = vmax.f32 %v363_v9, 0.0  ;;  %v2449_v15 = vpack.c.bf16 %v462_v8, %v461_v7  ;;  %v367_v16 = vld [vmem:[%s3597_s12 + $0x20] sm:$0xff]  ;;  %v373_v20 = vmax.f32 %v365_v12, 0.0  ;;  %vm472_vm6 = vcmask 523264  }
  0xbb   : > { %2445 = vmatprep.subr.bf16.mxu0 %v3316_v0  ;;  %v368_v17 = vld [vmem:[%s3597_s12 + $0x28] sm:$0xff]  ;;  %v369_v18 = vld [vmem:[%s3597_s12 + $0x30] sm:$0xff]  ;;  %v372_v19 = vmax.f32 %v364_v11, 0.0  ;;  %v374_v21 = vmax.f32 %v366_v13, 0.0  ;;  %v370_v22 = vld [vmem:[%s3597_s12 + $0x38] sm:$0xff]  ;;  %v375_v23 = vmax.f32 %v367_v16, 0.0 }
  0xbc   : > { %v376_v24 = vmax.f32 %v368_v17, 0.0  ;;  %v377_v25 = vmax.f32 %v369_v18, 0.0  ;;  %v380_v26 = vsel %vm379_vm1, %v371_v14, 0.0  ;;  %v463_v27 = vld [vmem:[#allocation5 + $0x30] sm:$0xff]  ;;  %v464_v28 = vld [vmem:[#allocation5 + $0x38] sm:$0xff]  ;;  %v378_v29 = vmax.f32 %v370_v22, 0.0 }
  0xbd   : > { %v381_v30 = vsel %vm379_vm1, %v372_v19, 0.0  ;;  %v383_v31 = vsel %vm379_vm1, %v373_v20, 0.0  ;;  %v385_v32 = vsel %vm379_vm1, %v374_v21, 0.0  ;;  %v387_v34 = vsel %vm379_vm1, %v375_v23, 0.0  ;;  %v645_v41 = vld [vmem:[#allocation8 + $0x308] sm:$0xff]  ;;  %v651_v46 = vld [vmem:[#allocation8 + $0x338] sm:$0xff] }
  0xbe   : > { %2447 = vmatpush3.bf16.msra.mxu0 %v2446_v10  ;;  %v382_v33 = vadd.f32 %v381_v30, %v380_v26  ;;  %v398_v35 = vsel %vm397_vm2, %v371_v14, 0.0  ;;  %v399_v36 = vsel %vm397_vm2, %v372_v19, 0.0  ;;  %v401_v38 = vsel %vm397_vm2, %v373_v20, 0.0  ;;  %v647_v47 = vld [vmem:[#allocation8 + $0x318] sm:$0xff]  ;;  %v653_v48 = vld [vmem:[#allocation8 + $0x348] sm:$0xff]  ;;  %v644_v53 = vld [vmem:[#allocation8 + $0x300] sm:$0xff] }
  0xbf   : > { %2448 = vmatprep.subr.bf16.mxu0 %v3316_v0  ;;  %v400_v37 = vadd.f32 %v399_v36, %v398_v35  ;;  %v403_v39 = vsel %vm397_vm2, %v374_v21, 0.0  ;;  %v405_v40 = vsel %vm397_vm2, %v375_v23, 0.0  ;;  %v2452_v42 = vpack.c.bf16 %v464_v28, %v463_v27  ;;  %v650_v54 = vld [vmem:[#allocation8 + $0x330] sm:$0xff]  ;;  %v657_v59 = vld [vmem:[#allocation8 + $0x368] sm:$0xff]  ;;  %v663_v60 = vld [vmem:[#allocation8 + $0x398] sm:$0xff]  ;;  %s2305_s9 = sshll.u32 %s3381_s30, 4 }
  0xc0   : > { %v384_v43 = vadd.f32 %v383_v31, %v382_v33  ;;  %v418_v44 = vadd.f32 %v387_v34, %v385_v32  ;;  %v419_v45 = vsel %vm379_vm1, %v376_v24, 0.0  ;;  %v421_v50 = vsel %vm379_vm1, %v377_v25, 0.0  ;;  %v656_v3 = vld [vmem:[#allocation8 + $0x360] sm:$0xff]  ;;  %v662_v4 = vld [vmem:[#allocation8 + $0x390] sm:$0xff]  ;;  %v669_v9 = vld [vmem:[#allocation8 + $0x3c8] sm:$0xff]  ;;  %s362_s21 = scalar_lea.vmem [#allocation13], %s3593_s22  ;;  %s3999_s20 = scalar_lea.hbm %s4050_s7, %s2305_s9 }
  0xc1   : > { %v402_v49 = vadd.f32 %v401_v38, %v400_v37  ;;  %v433_v51 = vadd.f32 %v405_v40, %v403_v39  ;;  %v434_v52 = vsel %vm397_vm2, %v376_v24, 0.0  ;;  %v423_v57 = vsel %vm379_vm1, %v378_v29, 0.0  ;;  %v675_v10 = vld [vmem:[#allocation8 + $0x3f8] sm:$0xff]  ;;  %v668_v20 = vld [vmem:[#allocation8 + $0x3c0] sm:$0xff]  ;;  %v674_v21 = vld [vmem:[#allocation8 + $0x3f0] sm:$0xff]  ;;  %s2171_s12 = sshll.u32 %s362_s21, 4  ;;  %s4001_s12 = int_to_ptr.vmem [resolvable:$true] %s2171_s12 }
  0xc2   : > { %2450 = vmatpush3.bf16.msra.mxu0 %v2449_v15  ;;  %v386_v55 = vadd.f32 %v385_v32, %v384_v43  ;;  %v420_v56 = vadd.f32 %v419_v45, %v418_v44  ;;  %v436_v58 = vsel %vm397_vm2, %v377_v25, 0.0  ;;  %v2454_v63 = vpack.c.bf16 %v651_v46, %v645_v41  ;;  %v681_v23 = vld [vmem:[#allocation8 + $0x428] sm:$0xff]  ;;  %v687_v24 = vld [vmem:[#allocation8 + $0x458] sm:$0xff]  ;;  %v680_v35 = vld [vmem:[#allocation8 + $0x420] sm:$0xff]  ;;  %s2159_s13 = scalar_lea.sflag [#allocation4], %s3593_s22  ;;  %s3226_s14 = scalar_lea.vmem %s4001_s12, 16 }
  0xc3   : > { %2451 = vmatprep.subr.bf16.mxu0 %v3316_v0  ;;  %v404_v61 = vadd.f32 %v403_v39, %v402_v49  ;;  %v435_v62 = vadd.f32 %v434_v52, %v433_v51  ;;  %v2486_v2 = vpack.c.bf16 %v653_v48, %v647_v47  ;;  %v438_v7 = vsel %vm397_vm2, %v378_v29, 0.0  ;;  %v686_v36 = vld [vmem:[#allocation8 + $0x450] sm:$0xff]  ;;  %v693_v39 = vld [vmem:[#allocation8 + $0x488] sm:$0xff]  ;;  %v692_v49 = vld [vmem:[#allocation8 + $0x480] sm:$0xff]  ;;  %p3227_p2 = scmp.ne.s32.totalorder %s4001_s12, %s3226_s14  ;;  %p4071_p7 = scmp.ne.s32.totalorder %s4060_s17, 0 }
  0xc4   : > { %v388_v5 = vadd.f32 %v387_v34, %v386_v55  ;;  %v422_v6 = vadd.f32 %v421_v50, %v420_v56  ;;  %v2456_v8 = vpack.c.bf16 %v650_v54, %v644_v53  ;;  %2455 = vmatprep.subr.bf16.mxu1 %v2454_v63  ;;  %v2458_v13 = vpack.c.bf16 %v663_v60, %v657_v59  ;;  %v698_v50 = vld [vmem:[#allocation8 + $0x4b0] sm:$0xff]  ;;  %v705_v53 = vld [vmem:[#allocation8 + $0x4e8] sm:$0xff]  ;;  %v711_v54 = vld [vmem:[#allocation8 + $0x518] sm:$0xff]  ;;  %s3319_s30 = smov [#allocation13]  }
  0xc5   : > { %v406_v11 = vadd.f32 %v405_v40, %v404_v61  ;;  %v437_v12 = vadd.f32 %v436_v58, %v435_v62  ;;  %v2460_v15 = vpack.c.bf16 %v662_v4, %v656_v3  ;;  %v2462_v19 = vpack.c.bf16 %v675_v10, %v669_v9  ;;  %v699_v40 = vld [vmem:[#allocation8 + $0x4b8] sm:$0xff]  ;;  %v704_v62 = vld [vmem:[#allocation8 + $0x4e0] sm:$0xff]  ;;  %v710_v63 = vld [vmem:[#allocation8 + $0x510] sm:$0xff]  ;;  %p3228_p10 = pnand %p3227_p2, %p4071_p7  ;;  %s3230_s19 = sshll.u32 %s3319_s30, 4  ;;  %s3231_s19 = int_to_ptr.vmem [resolvable:$false] %s3230_s19 }
  0xc6   : > { %2453 = vmatpush3.bf16.msra.mxu0 %v2452_v42  ;;  %v389_v0 = vsel %vm379_vm1, %v388_v5, 0.0  ;;  %v424_v14 = vadd.f32 %v423_v57, %v422_v6  ;;  %2457 = vmatpush1.bf16.msra.mxu1 %v2456_v8  ;;  %v2464_v30 = vpack.c.bf16 %v674_v21, %v668_v20  ;;  %v2466_v34 = vpack.c.bf16 %v687_v24, %v681_v23  ;;  %v717_v5 = vld [vmem:[#allocation8 + $0x548] sm:$0xff]  ;;  %v723_v6 = vld [vmem:[#allocation8 + $0x578] sm:$0xff]  ;;  %v646_v8 = vld [vmem:[#allocation8 + $0x310] sm:$0xff]  ;;  %s3232_s16 = scalar_lea.vmem %s3231_s19, 32  ;;  %p3233_p11 = scmp.lt.s32.totalorder %s4001_s12, %s3231_s19 }
  0xc7   : > { %v390_v16 = vrot.slane %v389_v0, 4  ;;  %v408_v17 = vrot.slane %v406_v11, 3  ;;  %v439_v18 = vadd.f32 %v438_v7, %v437_v12  ;;  %2487 = vmatprep.subr.bf16.mxu0 %v2486_v2  ;;  %2459 = vmatprep.subr.bf16.mxu1 %v2458_v13  ;;  %v2468_v45 = vpack.c.bf16 %v686_v36, %v680_v35  ;;  %v652_v9 = vld [vmem:[#allocation8 + $0x340] sm:$0xff]  ;;  %v659_v12 = vld [vmem:[#allocation8 + $0x378] sm:$0xff]  ;;  %v665_v13 = vld [vmem:[#allocation8 + $0x3a8] sm:$0xff]  ;;  %p3229_p1 = pneg %p3228_p10  ;;  %p3234_p12 = scmp.lt.s32.totalorder %s3232_s16, %s3226_s14 }
  0xc8   : > { %v425_v22 = vsel %vm379_vm1, %v424_v14, 0.0  ;;  %v2470_v48 = vpack.c.bf16 %v699_v40, %v693_v39  ;;  %v2472_v59 = vpack.c.bf16 %v698_v50, %v692_v49  ;;  %v2474_v61 = vpack.c.bf16 %v711_v54, %v705_v53  ;;  %v664_v23 = vld [vmem:[#allocation8 + $0x3a0] sm:$0xff]  ;;  %v682_v36 = vld [vmem:[#allocation8 + $0x430] sm:$0xff]  ;;  %v701_v39 = vld [vmem:[#allocation8 + $0x4c8] sm:$0xff] }
  0xc9   : > { %v391_v25 = vadd.f32 %v390_v16, %v389_v0  ;;  %v410_v26 = vsel %vm379_vm1, %v408_v17, 0.0  ;;  %v426_v27 = vrot.slane %v425_v22, 4  ;;  %v441_v28 = vrot.slane %v439_v18, 3  ;;  %v722_v16 = vld [vmem:[#allocation8 + $0x570] sm:$0xff]  ;;  %v712_v49 = vld [vmem:[#allocation8 + $0x520] sm:$0xff]  ;;  %v719_v50 = vld [vmem:[#allocation8 + $0x558] sm:$0xff]  ;;  %p3235_p13 = por %p3234_p12, %p3233_p11 }
  0xca   : > { %v411_v29 = vrot.slane %v410_v26, 4  ;;  %2461 = vmatpush1.bf16.msra.mxu1 %v2460_v15  ;;  %v2476_v0 = vpack.c.bf16 %v710_v63, %v704_v62  ;;  %v2478_v14 = vpack.c.bf16 %v723_v6, %v717_v5  ;;  %v716_v15 = vld [vmem:[#allocation8 + $0x540] sm:$0xff]  ;;  %v2490_v21 = vpack.c.bf16 %v665_v13, %v659_v12  ;;  %v718_v54 = vld [vmem:[#allocation8 + $0x550] sm:$0xff]  ;;  %v2303_v13 = vld [vmem:[#allocation7] ss:$0 sm:$0xff] }
  0xcb   : > { %v392_v31 = vrot.slane %v391_v25, 2  ;;  %v427_v32 = vadd.f32 %v426_v27, %v425_v22  ;;  %v443_v33 = vsel %vm379_vm1, %v441_v28, 0.0  ;;  %2463 = vmatprep.subr.bf16.mxu1 %v2462_v19  ;;  %v2488_v19 = vpack.c.bf16 %v652_v9, %v646_v8  ;;  %v658_v22 = vld [vmem:[#allocation8 + $0x370] sm:$0xff]  ;;  %v728_v62 = vld [vmem:[#allocation8 + $0x5a0] sm:$0xff]  ;;  %v655_v8 = vld [vmem:[#allocation8 + $0x358] sm:$0xff]  ;;  %p3236_p8 = pnand %p3235_p13, %p3229_p1 }
  0xcc   : > { %v412_v37 = vadd.f32 %v411_v29, %v410_v26  ;;  %v444_v38 = vrot.slane %v443_v33, 4  ;;  %v677_v26 = vld [vmem:[#allocation8 + $0x408] sm:$0xff]  ;;  %v2480_v27 = vpack.c.bf16 %v722_v16, %v716_v15  ;;  %v2492_v28 = vpack.c.bf16 %v664_v23, %v658_v22  ;;  %v734_v63 = vld [vmem:[#allocation8 + $0x5d0] sm:$0xff]  ;;  %v736_v5 = vld [vmem:[#allocation8 + $0x5e0] sm:$0xff] }
  0xcd   : > { %v393_v41 = vadd.f32 %v392_v31, %v391_v25  ;;  %v428_v42 = vrot.slane %v427_v32, 2  ;;  %v671_v25 = vld [vmem:[#allocation8 + $0x3d8] sm:$0xff]  ;;  %v676_v31 = vld [vmem:[#allocation8 + $0x400] sm:$0xff]  ;;  %v654_v15 = vld [vmem:[#allocation8 + $0x350] sm:$0xff]  ;;  %vm2156_vm7 = vcmask 73728  }
  0xce   : > { %v413_v43 = vrot.slane %v412_v37, 2  ;;  %v445_v44 = vadd.f32 %v444_v38, %v443_v33  ;;  %2465 = vmatpush1.bf16.msra.mxu1 %v2464_v30  ;;  %v2494_v29 = vpack.c.bf16 %v677_v26, %v671_v25  ;;  %v670_v30 = vld [vmem:[#allocation8 + $0x3d0] sm:$0xff]  ;;  %v689_v33 = vld [vmem:[#allocation8 + $0x468] sm:$0xff]  ;;  %v695_v38 = vld [vmem:[#allocation8 + $0x498] sm:$0xff] }
  0xcf   : > { %v394_v46 = vrot.slane %v393_v41, 1  ;;  %v429_v47 = vadd.f32 %v428_v42, %v427_v32  ;;  %2467 = vmatprep.subr.bf16.mxu1 %v2466_v34  ;;  %v683_v32 = vld [vmem:[#allocation8 + $0x438] sm:$0xff]  ;;  %v2496_v34 = vpack.c.bf16 %v676_v31, %v670_v30  ;;  %v694_v42 = vld [vmem:[#allocation8 + $0x490] sm:$0xff]  ;;  %v568_v23 = vld [vmem:[#allocation8 + $0xa8] sm:$0xff] }
  0xd0   : > { %v414_v51 = vadd.f32 %v413_v43, %v412_v37  ;;  %v446_v52 = vrot.slane %v445_v44, 2  ;;  %v2498_v35 = vpack.c.bf16 %v689_v33, %v683_v32  ;;  %v688_v37 = vld [vmem:[#allocation8 + $0x460] sm:$0xff]  ;;  %v550_v9 = vld [vmem:[#allocation8 + $0x18] sm:$0xff]  ;;  %v561_v32 = vld [vmem:[#allocation8 + $0x70] sm:$0xff] }
  0xd1   : > { %v395_v55 = vadd.f32 %v394_v46, %v393_v41  ;;  %v430_v56 = vrot.slane %v429_v47, 1  ;;  %v2500_v40 = vpack.c.bf16 %v688_v37, %v682_v36  ;;  %v2502_v41 = vpack.c.bf16 %v701_v39, %v695_v38  ;;  %v700_v43 = vld [vmem:[#allocation8 + $0x4c0] sm:$0xff]  ;;  %v562_v22 = vld [vmem:[#allocation8 + $0x78] sm:$0xff]  ;;  %v580_v37 = vld [vmem:[#allocation8 + $0x108] sm:$0xff] }
  0xd2   : > { %v415_v57 = vrot.slane %v414_v51, 1  ;;  %v447_v58 = vadd.f32 %v446_v52, %v445_v44  ;;  %2469 = vmatpush1.bf16.msra.mxu1 %v2468_v45  ;;  %v707_v44 = vld [vmem:[#allocation8 + $0x4f8] sm:$0xff]  ;;  %v713_v45 = vld [vmem:[#allocation8 + $0x528] sm:$0xff]  ;;  %v2504_v46 = vpack.c.bf16 %v700_v43, %v694_v42  ;;  %v2586_v31 = vpack.c.bf16 %v568_v23, %v562_v22  ;;  %v567_v33 = vld [vmem:[#allocation8 + $0xa0] sm:$0xff] }
  0xd3   : > { %v431_v60 = vadd.f32 %v430_v56, %v429_v47  ;;  %2471 = vmatprep.subr.bf16.mxu1 %v2470_v48  ;;  %v396_v2 = vmul.f32 0.04, %v395_v55  ;;  %v2506_v47 = vpack.c.bf16 %v713_v45, %v707_v44  ;;  %v706_v48 = vld [vmem:[#allocation8 + $0x4f0] sm:$0xff]  ;;  %v724_v55 = vld [vmem:[#allocation8 + $0x580] sm:$0xff]  ;;  %v574_v36 = vld [vmem:[#allocation8 + $0xd8] sm:$0xff]  ;;  %v2588_v39 = vpack.c.bf16 %v567_v33, %v561_v32 }
  0xd4   : > { %v416_v3 = vadd.f32 %v415_v57, %v414_v51  ;;  %v448_v4 = vrot.slane %v447_v58, 1  ;;  %v725_v51 = vld [vmem:[#allocation8 + $0x588] sm:$0xff]  ;;  %v2508_v52 = vpack.c.bf16 %v712_v49, %v706_v48  ;;  %v2512_v56 = vpack.c.bf16 %v724_v55, %v718_v54  ;;  %v573_v44 = vld [vmem:[#allocation8 + $0xd0] sm:$0xff]  ;;  %v579_v45 = vld [vmem:[#allocation8 + $0x100] sm:$0xff] }
  0xd5   : > { %v432_v7 = vmul.f32 0.04, %v431_v60  ;;  %v2510_v53 = vpack.c.bf16 %v725_v51, %v719_v50  ;;  %v729_v57 = vld [vmem:[#allocation8 + $0x5a8] sm:$0xff]  ;;  %v2590_v43 = vpack.c.bf16 %v580_v37, %v574_v36  ;;  %v586_v48 = vld [vmem:[#allocation8 + $0x138] sm:$0xff]  ;;  %v2592_v51 = vpack.c.bf16 %v579_v45, %v573_v44  ;;  %v627_v32 = vld [vmem:[#allocation8 + $0x280] sm:$0xff] }
  0xd6   : > { %v417_v10 = vmul.f32 0.04, %v416_v3  ;;  %v449_v11 = vadd.f32 %v448_v4, %v447_v58  ;;  %2473 = vmatpush1.bf16.msra.mxu1 %v2472_v59  ;;  %v735_v58 = vld [vmem:[#allocation8 + $0x5d8] sm:$0xff]  ;;  %v2484_v3 = vpack.c.bf16 %v734_v63, %v728_v62  ;;  %v730_v4 = vld [vmem:[#allocation8 + $0x5b0] sm:$0xff]  ;;  %v592_v49 = vld [vmem:[#allocation8 + $0x168] sm:$0xff] }
  0xd7   : > { %2475 = vmatprep.subr.bf16.mxu1 %v2474_v61  ;;  %v731_v59 = vld [vmem:[#allocation8 + $0x5b8] sm:$0xff]  ;;  %v2482_v60 = vpack.c.bf16 %v735_v58, %v729_v57  ;;  %v737_v61 = vld [vmem:[#allocation8 + $0x5e8] sm:$0xff]  ;;  %v2516_v6 = vpack.c.bf16 %v736_v5, %v730_v4  ;;  %v2594_v55 = vpack.c.bf16 %v592_v49, %v586_v48  ;;  %v591_v57 = vld [vmem:[#allocation8 + $0x160] sm:$0xff] }
  0xd8   : > { %v450_v17 = vmul.f32 0.04, %v449_v11  ;;  %v452_v18 = vsel %vm451_vm3, %v396_v2, %v417_v10  ;;  %v2514_v2 = vpack.c.bf16 %v737_v61, %v731_v59  ;;  %v556_v11 = vld [vmem:[#allocation8 + $0x48] sm:$0xff]  ;;  %v703_v59 = vld [vmem:[#allocation8 + $0x4d8] sm:$0xff]  ;;  %v639_v44 = vld [vmem:[#allocation8 + $0x2e0] sm:$0xff] }
  0xd9   : > { %v454_v20 = vsel %vm453_vm4, %v452_v18, %v432_v7  ;;  %v649_v7 = vld [vmem:[#allocation8 + $0x328] sm:$0xff]  ;;  %v2582_v12 = vpack.c.bf16 %v556_v11, %v550_v9  ;;  %v549_v18 = vld [vmem:[#allocation8 + $0x10] sm:$0xff]  ;;  %v715_v9 = vld [vmem:[#allocation8 + $0x538] sm:$0xff] }
  0xda   : > { %v456_v24 = vsel %vm455_vm5, %v454_v20, %v450_v17  ;;  %2477 = vmatpush1.bf16.msra.mxu1 %v2476_v0  ;;  %v2518_v10 = vpack.c.bf16 %v655_v8, %v649_v7  ;;  %v661_v20 = vld [vmem:[#allocation8 + $0x388] sm:$0xff]  ;;  %v603_v7 = vld [vmem:[#allocation8 + $0x1c0] sm:$0xff] }
  0xdb   : > { %2440 = vmatmul.mubr.msk.f32.vlgmr.msra.gmra.mrb[0].mxu0 %vm472_vm6, %v456_v24  ;;  %2479 = vmatprep.subr.bf16.mxu1 %v2478_v14  ;;  %v648_v14 = vld [vmem:[#allocation8 + $0x320] sm:$0xff]  ;;  %v697_v58 = vld [vmem:[#allocation8 + $0x4a8] sm:$0xff] }
  0xdc   : > { %2489 = vmatpush1.bf16.msra.mxu0 %v2488_v19  ;;  %878 = vmatprep.mubr.f32.mxu0 %v3318_v1  ;;  %v555_v19 = vld [vmem:[#allocation8 + $0x40] sm:$0xff]  ;;  %v2520_v25 = vpack.c.bf16 %v654_v15, %v648_v14  ;;  %v604_v61 = vld [vmem:[#allocation8 + $0x1c8] sm:$0xff]  ;;  %v2534_v4 = vpack.c.bf16 %v703_v59, %v697_v58  ;;  %v714_v14 = vld [vmem:[#allocation8 + $0x530] sm:$0xff] }
  0xdd   : > { %2491 = vmatprep.subr.bf16.mxu0 %v2490_v21  ;;  %v667_v21 = vld [vmem:[#allocation8 + $0x3b8] sm:$0xff]  ;;  %v2584_v26 = vpack.c.bf16 %v555_v19, %v549_v18  ;;  %v709_v8 = vld [vmem:[#allocation8 + $0x508] sm:$0xff]  ;;  %v615_v18 = vld [vmem:[#allocation8 + $0x220] sm:$0xff] }
  0xde   : > { %2481 = vmatpush1.bf16.msra.mxu1 %v2480_v27  ;;  %v660_v27 = vld [vmem:[#allocation8 + $0x380] sm:$0xff]  ;;  %v2522_v30 = vpack.c.bf16 %v667_v21, %v661_v20  ;;  %v616_v11 = vld [vmem:[#allocation8 + $0x228] sm:$0xff]  ;;  %v2538_v15 = vpack.c.bf16 %v715_v9, %v709_v8  ;;  %v727_v20 = vld [vmem:[#allocation8 + $0x598] sm:$0xff] }
  0xdf   : > { %2483 = vmatprep.subr.bf16.mxu1 %v2482_v60  ;;  %v598_v60 = vld [vmem:[#allocation8 + $0x198] sm:$0xff]  ;;  %v721_v19 = vld [vmem:[#allocation8 + $0x568] sm:$0xff] }
  0xe0   : > { %2493 = vmatpush1.bf16.msra.mxu0 %v2492_v28  ;;  %v666_v28 = vld [vmem:[#allocation8 + $0x3b0] sm:$0xff]  ;;  %v2598_v5 = vpack.c.bf16 %v604_v61, %v598_v60  ;;  %v622_v21 = vld [vmem:[#allocation8 + $0x258] sm:$0xff]  ;;  %v628_v22 = vld [vmem:[#allocation8 + $0x288] sm:$0xff] }
  0xe1   : > { %2495 = vmatprep.subr.bf16.mxu0 %v2494_v29  ;;  %v2524_v38 = vpack.c.bf16 %v666_v28, %v660_v27  ;;  %v726_v27 = vld [vmem:[#allocation8 + $0x590] sm:$0xff]  ;;  %v2542_v28 = vpack.c.bf16 %v727_v20, %v721_v19  ;;  %v733_v33 = vld [vmem:[#allocation8 + $0x5c8] sm:$0xff]  ;;  %v566_v58 = vld [vmem:[#allocation8 + $0x98] sm:$0xff] }
  0xe2   : > { %2485 = vmatpush1.bf16.msra.mxu1 %v2484_v3  ;;  %v702_v3 = vld [vmem:[#allocation8 + $0x4d0] sm:$0xff]  ;;  %v640_v36 = vld [vmem:[#allocation8 + $0x2e8] sm:$0xff]  ;;  %v1185_v59 = vld [vmem:[#allocation8 + $0x678] sm:$0xff] }
  0xe3   : > { %2519 = vmatprep.subr.bf16.mxu1 %v2518_v10  ;;  %v610_v10 = vld [vmem:[#allocation8 + $0x1f8] sm:$0xff]  ;;  %v548_v45 = vld [vmem:[#allocation8 + $0x8] sm:$0xff] }
  0xe4   : > { %2497 = vmatpush1.bf16.msra.mxu0 %v2496_v34  ;;  %v673_v34 = vld [vmem:[#allocation8 + $0x3e8] sm:$0xff]  ;;  %v578_v8 = vld [vmem:[#allocation8 + $0xf8] sm:$0xff] }
  0xe5   : > { %2499 = vmatprep.subr.bf16.mxu0 %v2498_v35  ;;  %v679_v35 = vld [vmem:[#allocation8 + $0x418] sm:$0xff]  ;;  %v1179_v48 = vld [vmem:[#allocation8 + $0x648] sm:$0xff] }
  0xe6   : > { %v2526_v42 = vpack.c.bf16 %v679_v35, %v673_v34  ;;  %v739_v34 = vld [vmem:[#allocation8 + $0x5f8] sm:$0xff]  ;;  %v1191_v60 = vld [vmem:[#allocation8 + $0x6a8] sm:$0xff] }
  0xe7   : > { %v634_v35 = vld [vmem:[#allocation8 + $0x2b8] sm:$0xff] }
  0xe8   : > { %2501 = vmatpush1.bf16.msra.mxu0 %v2500_v40  ;;  %v672_v40 = vld [vmem:[#allocation8 + $0x3e0] sm:$0xff]  ;;  %v1197_v9 = vld [vmem:[#allocation8 + $0x6d8] sm:$0xff] }
  0xe9   : > { %2503 = vmatprep.subr.bf16.mxu0 %v2502_v41  ;;  %v678_v41 = vld [vmem:[#allocation8 + $0x410] sm:$0xff]  ;;  %v590_v19 = vld [vmem:[#allocation8 + $0x158] sm:$0xff] }
  0xea   : > { %v2528_v50 = vpack.c.bf16 %v678_v41, %v672_v40  ;;  %v738_v40 = vld [vmem:[#allocation8 + $0x5f0] sm:$0xff]  ;;  %v2546_v41 = vpack.c.bf16 %v739_v34, %v733_v33  ;;  %v1209_v20 = vld [vmem:[#allocation8 + $0x738] sm:$0xff]  ;;  %v1227_v34 = vld [vmem:[#allocation8 + $0x7c8] sm:$0xff] }
  0xeb   : > { %v1221_v33 = vld [vmem:[#allocation8 + $0x798] sm:$0xff] }
  0xec   : > { %2505 = vmatpush1.bf16.msra.mxu0 %v2504_v46  ;;  %v685_v46 = vld [vmem:[#allocation8 + $0x448] sm:$0xff] }
  0xed   : > { %2507 = vmatprep.subr.bf16.mxu0 %v2506_v47  ;;  %v691_v47 = vld [vmem:[#allocation8 + $0x478] sm:$0xff] }
  0xee   : > { %v2530_v54 = vpack.c.bf16 %v691_v47, %v685_v46  ;;  %v554_v46 = vld [vmem:[#allocation8 + $0x38] sm:$0xff] }
  0xef   : > { %v1173_v47 = vld [vmem:[#allocation8 + $0x618] sm:$0xff] }
  0xf0   : > { %2509 = vmatpush1.bf16.msra.mxu0 %v2508_v52  ;;  %v684_v52 = vld [vmem:[#allocation8 + $0x440] sm:$0xff] }
  0xf1   : > { %2511 = vmatprep.subr.bf16.mxu0 %v2510_v53  ;;  %v690_v53 = vld [vmem:[#allocation8 + $0x470] sm:$0xff] }
  0xf2   : > { %v2532_v62 = vpack.c.bf16 %v690_v53, %v684_v52  ;;  %v553_v52 = vld [vmem:[#allocation8 + $0x30] sm:$0xff]  ;;  %v2550_v53 = vpack.c.bf16 %v554_v46, %v548_v45  ;;  %v1233_v45 = vld [vmem:[#allocation8 + $0x7f8] sm:$0xff]  ;;  %v1239_v46 = vld [vmem:[#allocation8 + $0x828] sm:$0xff] }
  0xf4   : > { %2513 = vmatpush1.bf16.msra.mxu0 %v2512_v56  ;;  %v585_v56 = vld [vmem:[#allocation8 + $0x130] sm:$0xff] }
  0xf5   : > { %2515 = vmatprep.subr.bf16.mxu0 %v2514_v2  ;;  %v2596_v63 = vpack.c.bf16 %v591_v57, %v585_v56  ;;  %v696_v2 = vld [vmem:[#allocation8 + $0x4a0] sm:$0xff]  ;;  %v560_v57 = vld [vmem:[#allocation8 + $0x68] sm:$0xff] }
  0xf6   : > { %v1178_v56 = vld [vmem:[#allocation8 + $0x640] sm:$0xff] }
  0xf8   : > { %2517 = vmatpush1.bf16.msra.mxu0 %v2516_v6  ;;  %v597_v6 = vld [vmem:[#allocation8 + $0x190] sm:$0xff] }
  0xf9   : > { %2583 = vmatprep.subr.bf16.mxu0 %v2582_v12  ;;  %v2536_v12 = vpack.c.bf16 %v702_v3, %v696_v2  ;;  %v565_v2 = vld [vmem:[#allocation8 + $0x90] sm:$0xff]  ;;  %v2554_v3 = vpack.c.bf16 %v566_v58, %v560_v57  ;;  %v1245_v57 = vld [vmem:[#allocation8 + $0x858] sm:$0xff]  ;;  %v1251_v58 = vld [vmem:[#allocation8 + $0x888] sm:$0xff] }
 0x1ae   : > { %v542_v0 = vpop.f32.mrb[0].mxu0 }
 0x1af   : > { %v543_v16 = vadd.f32 %v2303_v13, %v542_v0  ;;  %v2441_v17 = vpop.f32.mrb[1].mxu0  ;;  %v2600_v13 = vpack.c.bf16 %v603_v7, %v597_v6  ;;  %v708_v0 = vld [vmem:[#allocation8 + $0x500] sm:$0xff]  ;;  %v572_v7 = vld [vmem:[#allocation8 + $0xc8] sm:$0xff] }
 0x1b0   : > { %v609_v17 = vld [vmem:[#allocation8 + $0x1f0] sm:$0xff]  ;;  %v2540_v23 = vpack.c.bf16 %v714_v14, %v708_v0  ;;  %v1190_v6 = vld [vmem:[#allocation8 + $0x6a0] sm:$0xff]  ;;  %v2558_v14 = vpack.c.bf16 %v578_v8, %v572_v7  ;;  %v1257_v7 = vld [vmem:[#allocation8 + $0x8b8] sm:$0xff] }
 0x1b1   : > { %v3651_v24 = vmax.f32 %v543_v16, 0.0  ;;  %v2602_v16 = vpack.c.bf16 %v616_v11, %v610_v10  ;;  %v1203_v10 = vld [vmem:[#allocation8 + $0x708] sm:$0xff]  ;;  %v577_v0 = vld [vmem:[#allocation8 + $0xf0] sm:$0xff] }
 0x1b2   : > { %v1263_v8 = vld [vmem:[#allocation8 + $0x8e8] sm:$0xff] }
 0x1b3   : > { %v3654_v29 = vrot.slane %v3651_v24, 1 }
 0x1b5   : > { %808 = vmatmul.mubr.f32.vlgmr.msra.gmra.mrb[0].mxu1 %v3654_v29  ;;  %879 = vmatmul.mubr.f32.vlgmr.msra.gmra.mrb[2].mxu0 %v3654_v29 }
 0x1b6   : > { %2521 = vmatpush1.bf16.msra.mxu1 %v2520_v25  ;;  %2585 = vmatpush1.bf16.msra.mxu0 %v2584_v26  ;;  %v2604_v25 = vpack.c.bf16 %v615_v18, %v609_v17  ;;  %v720_v26 = vld [vmem:[#allocation8 + $0x560] sm:$0xff]  ;;  %v584_v18 = vld [vmem:[#allocation8 + $0x128] sm:$0xff] }
 0x1b7   : > { %2523 = vmatprep.subr.bf16.mxu1 %v2522_v30  ;;  %2587 = vmatprep.subr.bf16.mxu0 %v2586_v31  ;;  %v2606_v30 = vpack.c.bf16 %v628_v22, %v622_v21  ;;  %v621_v31 = vld [vmem:[#allocation8 + $0x250] sm:$0xff]  ;;  %v2544_v37 = vpack.c.bf16 %v726_v27, %v720_v26  ;;  %v1202_v17 = vld [vmem:[#allocation8 + $0x700] sm:$0xff]  ;;  %v1215_v21 = vld [vmem:[#allocation8 + $0x768] sm:$0xff]  ;;  %v2562_v26 = vpack.c.bf16 %v590_v19, %v584_v18 }
 0x1b8   : > { %949 = vmatprep.mubr.f32.mxu1 %v3318_v1  ;;  %1091 = vmatprep.mubr.f32.mxu0 %v3318_v1  ;;  %v2690_v27 = vpack.c.bf16 %v1215_v21, %v1209_v20  ;;  %v1491_v18 = vld [vmem:[#allocation8 + $0x918] sm:$0xff]  ;;  %v1497_v19 = vld [vmem:[#allocation8 + $0x948] sm:$0xff] }
 0x1ba   : > { %2525 = vmatpush1.bf16.msra.mxu1 %v2524_v38  ;;  %2589 = vmatpush1.bf16.msra.mxu0 %v2588_v39  ;;  %v2608_v38 = vpack.c.bf16 %v627_v32, %v621_v31  ;;  %v732_v39 = vld [vmem:[#allocation8 + $0x5c0] sm:$0xff]  ;;  %v596_v31 = vld [vmem:[#allocation8 + $0x188] sm:$0xff]  ;;  %v602_v32 = vld [vmem:[#allocation8 + $0x1b8] sm:$0xff] }
 0x1bb   : > { %2527 = vmatprep.subr.bf16.mxu1 %v2526_v42  ;;  %2591 = vmatprep.subr.bf16.mxu0 %v2590_v43  ;;  %v2610_v42 = vpack.c.bf16 %v640_v36, %v634_v35  ;;  %v633_v43 = vld [vmem:[#allocation8 + $0x2b0] sm:$0xff]  ;;  %v2548_v49 = vpack.c.bf16 %v738_v40, %v732_v39  ;;  %v2566_v39 = vpack.c.bf16 %v602_v32, %v596_v31  ;;  %v1503_v31 = vld [vmem:[#allocation8 + $0x978] sm:$0xff]  ;;  %v1509_v32 = vld [vmem:[#allocation8 + $0x9a8] sm:$0xff] }
 0x1bc   : > { %v2694_v40 = vpack.c.bf16 %v1227_v34, %v1221_v33 }
 0x1be   : > { %2529 = vmatpush1.bf16.msra.mxu1 %v2528_v50  ;;  %2593 = vmatpush1.bf16.msra.mxu0 %v2592_v51  ;;  %v2612_v50 = vpack.c.bf16 %v639_v44, %v633_v43  ;;  %v547_v51 = vld [vmem:[#allocation8] sm:$0xff]  ;;  %v608_v43 = vld [vmem:[#allocation8 + $0x1e8] sm:$0xff]  ;;  %v614_v44 = vld [vmem:[#allocation8 + $0x218] sm:$0xff] }
 0x1bf   : > { %2531 = vmatprep.subr.bf16.mxu1 %v2530_v54  ;;  %2595 = vmatprep.subr.bf16.mxu0 %v2594_v55  ;;  %v2678_v54 = vpack.c.bf16 %v1179_v48, %v1173_v47  ;;  %v1172_v55 = vld [vmem:[#allocation8 + $0x610] sm:$0xff]  ;;  %v2552_v61 = vpack.c.bf16 %v553_v52, %v547_v51  ;;  %v2570_v51 = vpack.c.bf16 %v614_v44, %v608_v43  ;;  %v582_v43 = vld [vmem:[#allocation8 + $0x118] sm:$0xff] }
 0x1c0   : > { %v2698_v52 = vpack.c.bf16 %v1239_v46, %v1233_v45  ;;  %v1515_v44 = vld [vmem:[#allocation8 + $0x9d8] sm:$0xff]  ;;  %v1521_v45 = vld [vmem:[#allocation8 + $0xa08] sm:$0xff] }
 0x1c2   : > { %2533 = vmatpush1.bf16.msra.mxu1 %v2532_v62  ;;  %2597 = vmatpush1.bf16.msra.mxu0 %v2596_v63  ;;  %v2680_v62 = vpack.c.bf16 %v1178_v56, %v1172_v55  ;;  %v559_v63 = vld [vmem:[#allocation8 + $0x60] sm:$0xff]  ;;  %v620_v55 = vld [vmem:[#allocation8 + $0x248] sm:$0xff]  ;;  %v626_v56 = vld [vmem:[#allocation8 + $0x278] sm:$0xff] }
 0x1c3   : > { %2535 = vmatprep.subr.bf16.mxu1 %v2534_v4  ;;  %2599 = vmatprep.subr.bf16.mxu0 %v2598_v5  ;;  %v2682_v4 = vpack.c.bf16 %v1191_v60, %v1185_v59  ;;  %v1184_v5 = vld [vmem:[#allocation8 + $0x670] sm:$0xff]  ;;  %v2556_v11 = vpack.c.bf16 %v565_v2, %v559_v63  ;;  %v2574_v63 = vpack.c.bf16 %v626_v56, %v620_v55  ;;  %v594_v55 = vld [vmem:[#allocation8 + $0x178] sm:$0xff] }
 0x1c4   : > { %v2702_v2 = vpack.c.bf16 %v1251_v58, %v1245_v57  ;;  %v1527_v56 = vld [vmem:[#allocation8 + $0xa38] sm:$0xff]  ;;  %v1533_v57 = vld [vmem:[#allocation8 + $0xa68] sm:$0xff] }
 0x1c6   : > { %2537 = vmatpush1.bf16.msra.mxu1 %v2536_v12  ;;  %2601 = vmatpush1.bf16.msra.mxu0 %v2600_v13  ;;  %v2684_v12 = vpack.c.bf16 %v1190_v6, %v1184_v5  ;;  %v571_v13 = vld [vmem:[#allocation8 + $0xc0] sm:$0xff]  ;;  %v632_v5 = vld [vmem:[#allocation8 + $0x2a8] sm:$0xff]  ;;  %v638_v6 = vld [vmem:[#allocation8 + $0x2d8] sm:$0xff] }
 0x1c7   : > { %2539 = vmatprep.subr.bf16.mxu1 %v2538_v15  ;;  %2603 = vmatprep.subr.bf16.mxu0 %v2602_v16  ;;  %v2686_v15 = vpack.c.bf16 %v1203_v10, %v1197_v9  ;;  %v1196_v16 = vld [vmem:[#allocation8 + $0x6d0] sm:$0xff] }
 0x1c8   : > { %v2688_v22 = vpack.c.bf16 %v1202_v17, %v1196_v16  ;;  %v552_v16 = vld [vmem:[#allocation8 + $0x28] sm:$0xff]  ;;  %v558_v17 = vld [vmem:[#allocation8 + $0x58] sm:$0xff] }
 0x1ca   : > { %2541 = vmatpush1.bf16.msra.mxu1 %v2540_v23  ;;  %2605 = vmatpush1.bf16.msra.mxu0 %v2604_v25  ;;  %v583_v23 = vld [vmem:[#allocation8 + $0x120] sm:$0xff]  ;;  %v589_v25 = vld [vmem:[#allocation8 + $0x150] sm:$0xff] }
 0x1cb   : > { %2543 = vmatprep.subr.bf16.mxu1 %v2542_v28  ;;  %2607 = vmatprep.subr.bf16.mxu0 %v2606_v30  ;;  %v1208_v28 = vld [vmem:[#allocation8 + $0x730] sm:$0xff]  ;;  %v1214_v30 = vld [vmem:[#allocation8 + $0x760] sm:$0xff]  ;;  %v2564_v35 = vpack.c.bf16 %v589_v25, %v583_v23  ;;  %v2614_v23 = vpack.c.bf16 %v558_v17, %v552_v16  ;;  %v2774_v25 = vpack.c.bf16 %v1497_v19, %v1491_v18  ;;  %v618_v16 = vld [vmem:[#allocation8 + $0x238] sm:$0xff] }
 0x1cc   : > { %v2692_v36 = vpack.c.bf16 %v1214_v30, %v1208_v28  ;;  %v564_v28 = vld [vmem:[#allocation8 + $0x88] sm:$0xff]  ;;  %v570_v30 = vld [vmem:[#allocation8 + $0xb8] sm:$0xff] }
 0x1cd   : > { %v1551_v17 = vld [vmem:[#allocation8 + $0xaf8] sm:$0xff]  ;;  %v1557_v18 = vld [vmem:[#allocation8 + $0xb28] sm:$0xff] }
 0x1ce   : > { %2545 = vmatpush1.bf16.msra.mxu1 %v2544_v37  ;;  %2609 = vmatpush1.bf16.msra.mxu0 %v2608_v38  ;;  %v595_v37 = vld [vmem:[#allocation8 + $0x180] sm:$0xff]  ;;  %v601_v38 = vld [vmem:[#allocation8 + $0x1b0] sm:$0xff] }
 0x1cf   : > { %2547 = vmatprep.subr.bf16.mxu1 %v2546_v41  ;;  %2611 = vmatprep.subr.bf16.mxu0 %v2610_v42  ;;  %v1220_v41 = vld [vmem:[#allocation8 + $0x790] sm:$0xff]  ;;  %v1226_v42 = vld [vmem:[#allocation8 + $0x7c0] sm:$0xff]  ;;  %v2568_v47 = vpack.c.bf16 %v601_v38, %v595_v37  ;;  %v3665_v37 = vrot.slane %v3651_v24, 2  ;;  %v2618_v38 = vpack.c.bf16 %v570_v30, %v564_v28  ;;  %v630_v28 = vld [vmem:[#allocation8 + $0x298] sm:$0xff] }
 0x1d0   : > { %v2696_v48 = vpack.c.bf16 %v1226_v42, %v1220_v41  ;;  %v1508_v41 = vld [vmem:[#allocation8 + $0x9a0] sm:$0xff]  ;;  %v576_v42 = vld [vmem:[#allocation8 + $0xe8] sm:$0xff]  ;;  %v1563_v30 = vld [vmem:[#allocation8 + $0xb58] sm:$0xff] }
 0x1d2   : > { %2549 = vmatpush1.bf16.msra.mxu1 %v2548_v49  ;;  %2613 = vmatpush1.bf16.msra.mxu0 %v2612_v50  ;;  %v607_v49 = vld [vmem:[#allocation8 + $0x1e0] sm:$0xff]  ;;  %v613_v50 = vld [vmem:[#allocation8 + $0x210] sm:$0xff] }
 0x1d3   : > { %2551 = vmatprep.subr.bf16.mxu1 %v2550_v53  ;;  %2679 = vmatprep.subr.bf16.mxu0 %v2678_v54  ;;  %v1232_v53 = vld [vmem:[#allocation8 + $0x7f0] sm:$0xff]  ;;  %v1238_v54 = vld [vmem:[#allocation8 + $0x820] sm:$0xff]  ;;  %v2572_v59 = vpack.c.bf16 %v613_v50, %v607_v49  ;;  %v2622_v50 = vpack.c.bf16 %v582_v43, %v576_v42  ;;  %v642_v42 = vld [vmem:[#allocation8 + $0x2f8] sm:$0xff] }
 0x1d4   : > { %v2700_v60 = vpack.c.bf16 %v1238_v54, %v1232_v53  ;;  %v581_v49 = vld [vmem:[#allocation8 + $0x110] sm:$0xff]  ;;  %v1520_v53 = vld [vmem:[#allocation8 + $0xa00] sm:$0xff]  ;;  %v588_v54 = vld [vmem:[#allocation8 + $0x148] sm:$0xff] }
 0x1d5   : > { %950 = vmatmul.mubr.f32.vlgmr.msra.gmra.mrb[2].mxu1 %v3654_v29  ;;  %1092 = vmatmul.mubr.f32.vlgmr.msra.gmra.mrb[2].mxu0 %v3651_v24  ;;  %v2560_v29 = vpack.c.bf16 %v577_v0, %v571_v13  ;;  %v2578_v13 = vpack.c.bf16 %v638_v6, %v632_v5  ;;  %v2706_v0 = vpack.c.bf16 %v1263_v8, %v1257_v7  ;;  %v606_v5 = vld [vmem:[#allocation8 + $0x1d8] sm:$0xff]  ;;  %v1545_v7 = vld [vmem:[#allocation8 + $0xac8] sm:$0xff] }
 0x1d6   : > { %2553 = vmatpush1.bf16.msra.mxu1 %v2552_v61  ;;  %2681 = vmatpush1.bf16.msra.mxu0 %v2680_v62  ;;  %v619_v61 = vld [vmem:[#allocation8 + $0x240] sm:$0xff]  ;;  %v625_v62 = vld [vmem:[#allocation8 + $0x270] sm:$0xff]  ;;  %v1539_v6 = vld [vmem:[#allocation8 + $0xa98] sm:$0xff] }
 0x1d7   : > { %2555 = vmatprep.subr.bf16.mxu1 %v2554_v3  ;;  %2683 = vmatprep.subr.bf16.mxu0 %v2682_v4  ;;  %v1244_v3 = vld [vmem:[#allocation8 + $0x850] sm:$0xff]  ;;  %v1250_v4 = vld [vmem:[#allocation8 + $0x880] sm:$0xff]  ;;  %v2576_v9 = vpack.c.bf16 %v625_v62, %v619_v61  ;;  %v2626_v62 = vpack.c.bf16 %v594_v55, %v588_v54  ;;  %v1575_v43 = vld [vmem:[#allocation8 + $0xbb8] sm:$0xff] }
 0x1d8   : > { %1020 = vmatprep.mubr.f32.mxu1 %v3318_v1  ;;  %1403 = vmatprep.mubr.f32.mxu0 %v3318_v1  ;;  %v2704_v10 = vpack.c.bf16 %v1250_v4, %v1244_v3  ;;  %v593_v61 = vld [vmem:[#allocation8 + $0x170] sm:$0xff]  ;;  %v1532_v3 = vld [vmem:[#allocation8 + $0xa60] sm:$0xff]  ;;  %v600_v4 = vld [vmem:[#allocation8 + $0x1a8] sm:$0xff] }
 0x1d9   : > { %v1177_v54 = vld [vmem:[#allocation8 + $0x638] sm:$0xff] }
 0x1da   : > { %2557 = vmatpush1.bf16.msra.mxu1 %v2556_v11  ;;  %2685 = vmatpush1.bf16.msra.mxu0 %v2684_v12  ;;  %v631_v11 = vld [vmem:[#allocation8 + $0x2a0] sm:$0xff]  ;;  %v637_v12 = vld [vmem:[#allocation8 + $0x2d0] sm:$0xff] }
 0x1db   : > { %2559 = vmatprep.subr.bf16.mxu1 %v2558_v14  ;;  %2687 = vmatprep.subr.bf16.mxu0 %v2686_v15  ;;  %v1256_v14 = vld [vmem:[#allocation8 + $0x8b0] sm:$0xff]  ;;  %v1262_v15 = vld [vmem:[#allocation8 + $0x8e0] sm:$0xff]  ;;  %v2580_v20 = vpack.c.bf16 %v637_v12, %v631_v11  ;;  %v2630_v12 = vpack.c.bf16 %v606_v5, %v600_v4  ;;  %v1195_v5 = vld [vmem:[#allocation8 + $0x6c8] sm:$0xff] }
 0x1dc   : > { %v2708_v21 = vpack.c.bf16 %v1262_v15, %v1256_v14  ;;  %v605_v11 = vld [vmem:[#allocation8 + $0x1d0] sm:$0xff]  ;;  %v1544_v14 = vld [vmem:[#allocation8 + $0xac0] sm:$0xff]  ;;  %v612_v15 = vld [vmem:[#allocation8 + $0x208] sm:$0xff] }
 0x1dd   : > { %v1188_v4 = vld [vmem:[#allocation8 + $0x690] sm:$0xff] }
 0x1de   : > { %2561 = vmatpush1.bf16.msra.mxu1 %v2560_v29  ;;  %2689 = vmatpush1.bf16.msra.mxu0 %v2688_v22  ;;  %v551_v29 = vld [vmem:[#allocation8 + $0x20] sm:$0xff]  ;;  %v557_v22 = vld [vmem:[#allocation8 + $0x50] sm:$0xff] }
 0x1df   : > { %2563 = vmatprep.subr.bf16.mxu1 %v2562_v26  ;;  %2691 = vmatprep.subr.bf16.mxu0 %v2690_v27  ;;  %v1490_v26 = vld [vmem:[#allocation8 + $0x910] sm:$0xff]  ;;  %v1496_v27 = vld [vmem:[#allocation8 + $0x940] sm:$0xff]  ;;  %v2616_v33 = vpack.c.bf16 %v557_v22, %v551_v29  ;;  %v2634_v22 = vpack.c.bf16 %v618_v16, %v612_v15  ;;  %v1219_v16 = vld [vmem:[#allocation8 + $0x788] sm:$0xff] }
 0x1e0   : > { %v2776_v34 = vpack.c.bf16 %v1496_v27, %v1490_v26  ;;  %v617_v29 = vld [vmem:[#allocation8 + $0x230] sm:$0xff]  ;;  %v1556_v26 = vld [vmem:[#allocation8 + $0xb20] sm:$0xff]  ;;  %v624_v27 = vld [vmem:[#allocation8 + $0x268] sm:$0xff] }
 0x1e1   : > { %v1212_v15 = vld [vmem:[#allocation8 + $0x750] sm:$0xff] }
 0x1e2   : > { %2565 = vmatpush1.bf16.msra.mxu1 %v2564_v35  ;;  %2693 = vmatpush1.bf16.msra.mxu0 %v2692_v36  ;;  %v563_v35 = vld [vmem:[#allocation8 + $0x80] sm:$0xff]  ;;  %v569_v36 = vld [vmem:[#allocation8 + $0xb0] sm:$0xff] }
 0x1e3   : > { %2567 = vmatprep.subr.bf16.mxu1 %v2566_v39  ;;  %2695 = vmatprep.subr.bf16.mxu0 %v2694_v40  ;;  %v2778_v39 = vpack.c.bf16 %v1509_v32, %v1503_v31  ;;  %v1502_v40 = vld [vmem:[#allocation8 + $0x970] sm:$0xff]  ;;  %v2620_v46 = vpack.c.bf16 %v569_v36, %v563_v35  ;;  %v1569_v31 = vld [vmem:[#allocation8 + $0xb88] sm:$0xff]  ;;  %v2638_v36 = vpack.c.bf16 %v630_v28, %v624_v27  ;;  %v1249_v28 = vld [vmem:[#allocation8 + $0x878] sm:$0xff] }
 0x1e4   : > { %v629_v35 = vld [vmem:[#allocation8 + $0x290] sm:$0xff]  ;;  %v1243_v27 = vld [vmem:[#allocation8 + $0x848] sm:$0xff] }
 0x1e6   : > { %2569 = vmatpush1.bf16.msra.mxu1 %v2568_v47  ;;  %2697 = vmatpush1.bf16.msra.mxu0 %v2696_v48  ;;  %v2780_v47 = vpack.c.bf16 %v1508_v41, %v1502_v40  ;;  %v575_v48 = vld [vmem:[#allocation8 + $0xe0] sm:$0xff]  ;;  %v636_v41 = vld [vmem:[#allocation8 + $0x2c8] sm:$0xff] }
 0x1e7   : > { %2571 = vmatprep.subr.bf16.mxu1 %v2570_v51  ;;  %2699 = vmatprep.subr.bf16.mxu0 %v2698_v52  ;;  %v2782_v51 = vpack.c.bf16 %v1521_v45, %v1515_v44  ;;  %v1514_v52 = vld [vmem:[#allocation8 + $0x9d0] sm:$0xff]  ;;  %v2624_v58 = vpack.c.bf16 %v581_v49, %v575_v48  ;;  %v1568_v40 = vld [vmem:[#allocation8 + $0xb80] sm:$0xff]  ;;  %v1581_v44 = vld [vmem:[#allocation8 + $0xbe8] sm:$0xff]  ;;  %v2642_v48 = vpack.c.bf16 %v642_v42, %v636_v41 }
 0x1e8   : > { %v2802_v49 = vpack.c.bf16 %v1581_v44, %v1575_v43  ;;  %v1175_v41 = vld [vmem:[#allocation8 + $0x628] sm:$0xff]  ;;  %v1181_v42 = vld [vmem:[#allocation8 + $0x658] sm:$0xff] }
 0x1e9   : > { %v2710_v44 = vpack.c.bf16 %v1181_v42, %v1175_v41  ;;  %v1519_v41 = vld [vmem:[#allocation8 + $0x9f8] sm:$0xff] }
 0x1ea   : > { %2573 = vmatpush1.bf16.msra.mxu1 %v2572_v59  ;;  %2701 = vmatpush1.bf16.msra.mxu0 %v2700_v60  ;;  %v2784_v59 = vpack.c.bf16 %v1520_v53, %v1514_v52  ;;  %v587_v60 = vld [vmem:[#allocation8 + $0x140] sm:$0xff]  ;;  %v1171_v53 = vld [vmem:[#allocation8 + $0x608] sm:$0xff] }
 0x1eb   : > { %2575 = vmatprep.subr.bf16.mxu1 %v2574_v63  ;;  %2703 = vmatprep.subr.bf16.mxu0 %v2702_v2  ;;  %v2786_v63 = vpack.c.bf16 %v1533_v57, %v1527_v56  ;;  %v1526_v2 = vld [vmem:[#allocation8 + $0xa30] sm:$0xff]  ;;  %v2628_v8 = vpack.c.bf16 %v593_v61, %v587_v60  ;;  %v1580_v52 = vld [vmem:[#allocation8 + $0xbe0] sm:$0xff]  ;;  %v2646_v57 = vpack.c.bf16 %v1177_v54, %v1171_v53  ;;  %v1183_v60 = vld [vmem:[#allocation8 + $0x668] sm:$0xff] }
 0x1ec   : > { %v1189_v61 = vld [vmem:[#allocation8 + $0x698] sm:$0xff]  ;;  %v1199_v53 = vld [vmem:[#allocation8 + $0x6e8] sm:$0xff] }
 0x1ed   : > { %v1205_v54 = vld [vmem:[#allocation8 + $0x718] sm:$0xff] }
 0x1ee   : > { %2577 = vmatpush1.bf16.msra.mxu1 %v2576_v9  ;;  %2705 = vmatpush1.bf16.msra.mxu0 %v2704_v10  ;;  %v2788_v9 = vpack.c.bf16 %v1532_v3, %v1526_v2  ;;  %v599_v10 = vld [vmem:[#allocation8 + $0x1a0] sm:$0xff]  ;;  %v2650_v2 = vpack.c.bf16 %v1189_v61, %v1183_v60  ;;  %v1217_v60 = vld [vmem:[#allocation8 + $0x778] sm:$0xff] }
 0x1ef   : > { %2579 = vmatprep.subr.bf16.mxu1 %v2578_v13  ;;  %2707 = vmatprep.subr.bf16.mxu0 %v2706_v0  ;;  %v2790_v13 = vpack.c.bf16 %v1545_v7, %v1539_v6  ;;  %v1538_v0 = vld [vmem:[#allocation8 + $0xa90] sm:$0xff]  ;;  %v2632_v19 = vpack.c.bf16 %v605_v11, %v599_v10  ;;  %v1182_v3 = vld [vmem:[#allocation8 + $0x660] sm:$0xff]  ;;  %v1201_v6 = vld [vmem:[#allocation8 + $0x6f8] sm:$0xff] }
 0x1f0   : > { %v2652_v7 = vpack.c.bf16 %v1188_v4, %v1182_v3  ;;  %v1200_v10 = vld [vmem:[#allocation8 + $0x6f0] sm:$0xff]  ;;  %v1207_v11 = vld [vmem:[#allocation8 + $0x728] sm:$0xff] }
 0x1f1   : > { %v1216_v3 = vld [vmem:[#allocation8 + $0x770] sm:$0xff]  ;;  %v1223_v4 = vld [vmem:[#allocation8 + $0x7a8] sm:$0xff] }
 0x1f2   : > { %2581 = vmatpush1.bf16.msra.mxu1 %v2580_v20  ;;  %2709 = vmatpush1.bf16.msra.mxu0 %v2708_v21  ;;  %v2792_v20 = vpack.c.bf16 %v1544_v14, %v1538_v0  ;;  %v611_v21 = vld [vmem:[#allocation8 + $0x200] sm:$0xff] }
 0x1f3   : > { %2615 = vmatprep.subr.bf16.mxu1 %v2614_v23  ;;  %2775 = vmatprep.subr.bf16.mxu0 %v2774_v25  ;;  %v2794_v23 = vpack.c.bf16 %v1557_v18, %v1551_v17  ;;  %v1550_v25 = vld [vmem:[#allocation8 + $0xaf0] sm:$0xff]  ;;  %v2636_v32 = vpack.c.bf16 %v617_v29, %v611_v21  ;;  %v1206_v14 = vld [vmem:[#allocation8 + $0x720] sm:$0xff]  ;;  %v1231_v21 = vld [vmem:[#allocation8 + $0x7e8] sm:$0xff] }
 0x1f4   : > { %v2660_v17 = vpack.c.bf16 %v1212_v15, %v1206_v14  ;;  %v1237_v29 = vld [vmem:[#allocation8 + $0x818] sm:$0xff]  ;;  %v1240_v14 = vld [vmem:[#allocation8 + $0x830] sm:$0xff]  ;;  %v1247_v15 = vld [vmem:[#allocation8 + $0x868] sm:$0xff] }
 0x1f5   : > { %1021 = vmatmul.mubr.f32.vlgmr.msra.gmra.mrb[0].mxu1 %v3651_v24  ;;  %1404 = vmatmul.mubr.f32.vlgmr.msra.gmra.mrb[2].mxu0 %v3665_v37 }
 0x1f6   : > { %2617 = vmatpush1.bf16.msra.mxu1 %v2616_v33  ;;  %2777 = vmatpush1.bf16.msra.mxu0 %v2776_v34  ;;  %v2796_v33 = vpack.c.bf16 %v1556_v26, %v1550_v25  ;;  %v623_v34 = vld [vmem:[#allocation8 + $0x260] sm:$0xff]  ;;  %v1236_v26 = vld [vmem:[#allocation8 + $0x810] sm:$0xff] }
 0x1f7   : > { %2619 = vmatprep.subr.bf16.mxu1 %v2618_v38  ;;  %2779 = vmatprep.subr.bf16.mxu0 %v2778_v39  ;;  %v2798_v38 = vpack.c.bf16 %v1569_v31, %v1563_v30  ;;  %v1562_v39 = vld [vmem:[#allocation8 + $0xb50] sm:$0xff]  ;;  %v2640_v45 = vpack.c.bf16 %v629_v35, %v623_v34  ;;  %v1230_v25 = vld [vmem:[#allocation8 + $0x7e0] sm:$0xff]  ;;  %v2670_v31 = vpack.c.bf16 %v1249_v28, %v1243_v27  ;;  %v1255_v34 = vld [vmem:[#allocation8 + $0x8a8] sm:$0xff] }
 0x1f8   : > { %1162 = vmatprep.mubr.f32.mxu1 %v3318_v1  ;;  %1721 = vmatprep.mubr.f32.mxu0 %v3318_v1  ;;  %v2668_v30 = vpack.c.bf16 %v1236_v26, %v1230_v25  ;;  %v1261_v35 = vld [vmem:[#allocation8 + $0x8d8] sm:$0xff]  ;;  %v1264_v25 = vld [vmem:[#allocation8 + $0x8f0] sm:$0xff]  ;;  %v1489_v26 = vld [vmem:[#allocation8 + $0x908] sm:$0xff] }
 0x1f9   : > { %v1495_v27 = vld [vmem:[#allocation8 + $0x938] sm:$0xff] }
 0x1fa   : > { %2621 = vmatpush1.bf16.msra.mxu1 %v2620_v46  ;;  %2781 = vmatpush1.bf16.msra.mxu0 %v2780_v47  ;;  %v2800_v46 = vpack.c.bf16 %v1568_v40, %v1562_v39  ;;  %v635_v47 = vld [vmem:[#allocation8 + $0x2c0] sm:$0xff]  ;;  %v1260_v40 = vld [vmem:[#allocation8 + $0x8d0] sm:$0xff] }
 0x1fb   : > { %2623 = vmatprep.subr.bf16.mxu1 %v2622_v50  ;;  %2783 = vmatprep.subr.bf16.mxu0 %v2782_v51  ;;  %v641_v50 = vld [vmem:[#allocation8 + $0x2f0] sm:$0xff]  ;;  %v1254_v39 = vld [vmem:[#allocation8 + $0x8a0] sm:$0xff] }
 0x1fc   : > { %v1574_v51 = vld [vmem:[#allocation8 + $0xbb0] sm:$0xff]  ;;  %v2644_v55 = vpack.c.bf16 %v641_v50, %v635_v47  ;;  %v2676_v43 = vpack.c.bf16 %v1260_v40, %v1254_v39  ;;  %v1187_v47 = vld [vmem:[#allocation8 + $0x688] sm:$0xff] }
 0x1fd   : > { %v2804_v56 = vpack.c.bf16 %v1580_v52, %v1574_v51  ;;  %v1186_v51 = vld [vmem:[#allocation8 + $0x680] sm:$0xff]  ;;  %v1192_v52 = vld [vmem:[#allocation8 + $0x6b0] sm:$0xff]  ;;  %v1513_v40 = vld [vmem:[#allocation8 + $0x9c8] sm:$0xff] }
 0x1fe   : > { %2625 = vmatpush1.bf16.msra.mxu1 %v2624_v58  ;;  %2785 = vmatpush1.bf16.msra.mxu0 %v2784_v59  ;;  %v1170_v58 = vld [vmem:[#allocation8 + $0x600] sm:$0xff]  ;;  %v1176_v59 = vld [vmem:[#allocation8 + $0x630] sm:$0xff] }
 0x1ff   : > { %2627 = vmatprep.subr.bf16.mxu1 %v2626_v62  ;;  %2787 = vmatprep.subr.bf16.mxu0 %v2786_v63  ;;  %v2648_v62 = vpack.c.bf16 %v1176_v59, %v1170_v58  ;;  %v3672_v63 = vrot.slane %v3651_v24, 3  ;;  %v1204_v58 = vld [vmem:[#allocation8 + $0x710] sm:$0xff]  ;;  %v1211_v59 = vld [vmem:[#allocation8 + $0x748] sm:$0xff] }
 0x200   : > { %v1506_v39 = vld [vmem:[#allocation8 + $0x990] sm:$0xff] }
 0x202   : > { %2629 = vmatpush1.bf16.msra.mxu1 %v2628_v8  ;;  %2789 = vmatpush1.bf16.msra.mxu0 %v2788_v9  ;;  %v2654_v8 = vpack.c.bf16 %v1201_v6, %v1195_v5  ;;  %v1194_v9 = vld [vmem:[#allocation8 + $0x6c0] sm:$0xff]  ;;  %v1229_v5 = vld [vmem:[#allocation8 + $0x7d8] sm:$0xff] }
 0x203   : > { %2631 = vmatprep.subr.bf16.mxu1 %v2630_v12  ;;  %2791 = vmatprep.subr.bf16.mxu0 %v2790_v13  ;;  %v1213_v12 = vld [vmem:[#allocation8 + $0x758] sm:$0xff]  ;;  %v2656_v13 = vpack.c.bf16 %v1200_v10, %v1194_v9  ;;  %v1228_v9 = vld [vmem:[#allocation8 + $0x7d0] sm:$0xff]  ;;  %v1235_v10 = vld [vmem:[#allocation8 + $0x808] sm:$0xff] }
 0x204   : > { %v2658_v0 = vpack.c.bf16 %v1213_v12, %v1207_v11  ;;  %v1241_v11 = vld [vmem:[#allocation8 + $0x838] sm:$0xff] }
 0x206   : > { %2633 = vmatpush1.bf16.msra.mxu1 %v2632_v19  ;;  %2793 = vmatpush1.bf16.msra.mxu0 %v2792_v20  ;;  %v1218_v19 = vld [vmem:[#allocation8 + $0x780] sm:$0xff]  ;;  %v1224_v20 = vld [vmem:[#allocation8 + $0x7b0] sm:$0xff] }
 0x207   : > { %2635 = vmatprep.subr.bf16.mxu1 %v2634_v22  ;;  %2795 = vmatprep.subr.bf16.mxu0 %v2794_v23  ;;  %v2664_v22 = vpack.c.bf16 %v1224_v20, %v1218_v19  ;;  %v2666_v23 = vpack.c.bf16 %v1237_v29, %v1231_v21  ;;  %v1252_v19 = vld [vmem:[#allocation8 + $0x890] sm:$0xff]  ;;  %v1259_v20 = vld [vmem:[#allocation8 + $0x8c8] sm:$0xff]  ;;  %v1265_v21 = vld [vmem:[#allocation8 + $0x8f8] sm:$0xff] }
 0x20a   : > { %2637 = vmatpush1.bf16.msra.mxu1 %v2636_v32  ;;  %2797 = vmatpush1.bf16.msra.mxu0 %v2796_v33  ;;  %v1242_v32 = vld [vmem:[#allocation8 + $0x840] sm:$0xff]  ;;  %v1248_v33 = vld [vmem:[#allocation8 + $0x870] sm:$0xff] }
 0x20b   : > { %2639 = vmatprep.subr.bf16.mxu1 %v2638_v36  ;;  %2799 = vmatprep.subr.bf16.mxu0 %v2798_v38  ;;  %v2672_v36 = vpack.c.bf16 %v1248_v33, %v1242_v32  ;;  %v2674_v38 = vpack.c.bf16 %v1261_v35, %v1255_v34  ;;  %v1494_v32 = vld [vmem:[#allocation8 + $0x930] sm:$0xff]  ;;  %v1501_v33 = vld [vmem:[#allocation8 + $0x968] sm:$0xff]  ;;  %v1507_v34 = vld [vmem:[#allocation8 + $0x998] sm:$0xff] }
 0x20e   : > { %2641 = vmatpush1.bf16.msra.mxu1 %v2640_v45  ;;  %2801 = vmatpush1.bf16.msra.mxu0 %v2800_v46  ;;  %v1174_v45 = vld [vmem:[#allocation8 + $0x620] sm:$0xff]  ;;  %v1180_v46 = vld [vmem:[#allocation8 + $0x650] sm:$0xff] }
 0x20f   : > { %2643 = vmatprep.subr.bf16.mxu1 %v2642_v48  ;;  %2803 = vmatprep.subr.bf16.mxu0 %v2802_v49  ;;  %v1193_v48 = vld [vmem:[#allocation8 + $0x6b8] sm:$0xff]  ;;  %v2712_v49 = vpack.c.bf16 %v1180_v46, %v1174_v45  ;;  %v1518_v45 = vld [vmem:[#allocation8 + $0x9f0] sm:$0xff]  ;;  %v1525_v46 = vld [vmem:[#allocation8 + $0xa28] sm:$0xff] }
 0x210   : > { %v2714_v50 = vpack.c.bf16 %v1193_v48, %v1187_v47  ;;  %v1531_v47 = vld [vmem:[#allocation8 + $0xa58] sm:$0xff] }
 0x212   : > { %2645 = vmatpush1.bf16.msra.mxu1 %v2644_v55  ;;  %2805 = vmatpush1.bf16.msra.mxu0 %v2804_v56  ;;  %v2716_v55 = vpack.c.bf16 %v1192_v52, %v1186_v51  ;;  %v2718_v56 = vpack.c.bf16 %v1205_v54, %v1199_v53  ;;  %v1530_v51 = vld [vmem:[#allocation8 + $0xa50] sm:$0xff]  ;;  %v1537_v52 = vld [vmem:[#allocation8 + $0xa88] sm:$0xff]  ;;  %v1543_v53 = vld [vmem:[#allocation8 + $0xab8] sm:$0xff] }
 0x213   : > { %2647 = vmatprep.subr.bf16.mxu1 %v2646_v57  ;;  %v1198_v57 = vld [vmem:[#allocation8 + $0x6e0] sm:$0xff]  ;;  %v2758_v54 = vpack.c.bf16 %v1543_v53, %v1537_v52 }
 0x214   : > { %v2720_v61 = vpack.c.bf16 %v1204_v58, %v1198_v57  ;;  %v1549_v57 = vld [vmem:[#allocation8 + $0xae8] sm:$0xff]  ;;  %v1555_v58 = vld [vmem:[#allocation8 + $0xb18] sm:$0xff] }
 0x215   : > { %1163 = vmatmul.mubr.f32.vlgmr.msra.gmra.mrb[2].mxu1 %v3651_v24  ;;  %1722 = vmatmul.mubr.f32.vlgmr.msra.gmra.mrb[2].mxu0 %v3672_v63  ;;  %v1225_v24 = vld [vmem:[#allocation8 + $0x7b8] sm:$0xff]  ;;  %v1874_v53 = vld [vmem:[%s4048_s5 + $0xc8] sm:$0xff] }
 0x216   : > { %2649 = vmatpush1.bf16.msra.mxu1 %v2648_v62  ;;  %1332 = vmatprep.mubr.f32.mxu1 %v3318_v1  ;;  %v2662_v18 = vpack.c.bf16 %v1225_v24, %v1219_v16  ;;  %v2722_v62 = vpack.c.bf16 %v1217_v60, %v1211_v59  ;;  %v1253_v16 = vld [vmem:[#allocation8 + $0x898] sm:$0xff]  ;;  %v2762_v60 = vpack.c.bf16 %v1555_v58, %v1549_v57 }
 0x217   : > { %2651 = vmatprep.subr.bf16.mxu1 %v2650_v2  ;;  %v1210_v2 = vld [vmem:[#allocation8 + $0x740] sm:$0xff]  ;;  %v1535_v57 = vld [vmem:[#allocation8 + $0xa78] sm:$0xff] }
 0x218   : > { %v2724_v6 = vpack.c.bf16 %v1216_v3, %v1210_v2  ;;  %v1561_v2 = vld [vmem:[#allocation8 + $0xb48] sm:$0xff]  ;;  %v1567_v3 = vld [vmem:[#allocation8 + $0xb78] sm:$0xff] }
 0x219   : > { %v1873_v52 = vld [vmem:[%s4048_s5 + $0xc0] sm:$0xff] }
 0x21a   : > { %2653 = vmatpush1.bf16.msra.mxu1 %v2652_v7  ;;  %v2726_v7 = vpack.c.bf16 %v1229_v5, %v1223_v4  ;;  %v2766_v5 = vpack.c.bf16 %v1567_v3, %v1561_v2  ;;  %v1876_v2 = vld [vmem:[%s4048_s5 + $0xd8] sm:$0xff] }
 0x21b   : > { %2655 = vmatprep.subr.bf16.mxu1 %v2654_v8  ;;  %v1222_v8 = vld [vmem:[#allocation8 + $0x7a0] sm:$0xff] }
 0x21c   : > { %v2728_v12 = vpack.c.bf16 %v1228_v9, %v1222_v8  ;;  %v1573_v8 = vld [vmem:[#allocation8 + $0xba8] sm:$0xff]  ;;  %v1579_v9 = vld [vmem:[#allocation8 + $0xbd8] sm:$0xff] }
 0x21e   : > { %2657 = vmatpush1.bf16.msra.mxu1 %v2656_v13  ;;  %v2730_v13 = vpack.c.bf16 %v1241_v11, %v1235_v10  ;;  %v1572_v11 = vld [vmem:[#allocation8 + $0xba0] sm:$0xff] }
 0x21f   : > { %2659 = vmatprep.subr.bf16.mxu1 %v2658_v0  ;;  %v1234_v0 = vld [vmem:[#allocation8 + $0x800] sm:$0xff] }
 0x220   : > { %v2732_v24 = vpack.c.bf16 %v1240_v14, %v1234_v0  ;;  %v1493_v0 = vld [vmem:[#allocation8 + $0x928] sm:$0xff]  ;;  %v1499_v14 = vld [vmem:[#allocation8 + $0x958] sm:$0xff] }
 0x222   : > { %2661 = vmatpush1.bf16.msra.mxu1 %v2660_v17  ;;  %v2734_v17 = vpack.c.bf16 %v1253_v16, %v1247_v15  ;;  %v1865_v15 = vld [vmem:[%s4048_s5 + $0x80] sm:$0xff]  ;;  %v1866_v16 = vld [vmem:[%s4048_s5 + $0x88] sm:$0xff] }
 0x223   : > { %2663 = vmatprep.subr.bf16.mxu1 %v2662_v18  ;;  %v1246_v18 = vld [vmem:[#allocation8 + $0x860] sm:$0xff] }
 0x224   : > { %v2736_v29 = vpack.c.bf16 %v1252_v19, %v1246_v18  ;;  %v1850_v18 = vld [vmem:[%s4048_s5 + $0x8] sm:$0xff]  ;;  %v1867_v19 = vld [vmem:[%s4048_s5 + $0x90] sm:$0xff] }
 0x226   : > { %2665 = vmatpush1.bf16.msra.mxu1 %v2664_v22  ;;  %v2738_v22 = vpack.c.bf16 %v1265_v21, %v1259_v20  ;;  %v1868_v20 = vld [vmem:[%s4048_s5 + $0x98] sm:$0xff] }
 0x227   : > { %2667 = vmatprep.subr.bf16.mxu1 %v2666_v23  ;;  %v1258_v23 = vld [vmem:[#allocation8 + $0x8c0] sm:$0xff] }
 0x228   : > { %v2740_v28 = vpack.c.bf16 %v1264_v25, %v1258_v23  ;;  %v1851_v23 = vld [vmem:[%s4048_s5 + $0x10] sm:$0xff]  ;;  %v1852_v25 = vld [vmem:[%s4048_s5 + $0x18] sm:$0xff] }
 0x22a   : > { %2669 = vmatpush1.bf16.msra.mxu1 %v2668_v30  ;;  %v2742_v30 = vpack.c.bf16 %v1495_v27, %v1489_v26  ;;  %v1869_v26 = vld [vmem:[%s4048_s5 + $0xa0] sm:$0xff]  ;;  %v2806_v27 = vpack.c.bf16 %v1499_v14, %v1493_v0  ;;  %v1878_v0 = vld [vmem:[%s4048_s5 + $0xe8] sm:$0xff] }
 0x22b   : > { %2671 = vmatprep.subr.bf16.mxu1 %v2670_v31  ;;  %v1488_v31 = vld [vmem:[#allocation8 + $0x900] sm:$0xff] }
 0x22c   : > { %v2744_v35 = vpack.c.bf16 %v1494_v32, %v1488_v31  ;;  %v1870_v31 = vld [vmem:[%s4048_s5 + $0xa8] sm:$0xff] }
 0x22d   : > { %v1505_v32 = vld [vmem:[#allocation8 + $0x988] sm:$0xff] }
 0x22e   : > { %2673 = vmatpush1.bf16.msra.mxu1 %v2672_v36  ;;  %v2746_v36 = vpack.c.bf16 %v1507_v34, %v1501_v33  ;;  %v1511_v33 = vld [vmem:[#allocation8 + $0x9b8] sm:$0xff]  ;;  %v2844_v34 = vpack.c.bf16 %v1852_v25, %v1851_v23  ;;  %v1552_v23 = vld [vmem:[#allocation8 + $0xb00] sm:$0xff]  ;;  %v1558_v25 = vld [vmem:[#allocation8 + $0xb30] sm:$0xff] }
 0x22f   : > { %2675 = vmatprep.subr.bf16.mxu1 %v2674_v38  ;;  %v1500_v38 = vld [vmem:[#allocation8 + $0x960] sm:$0xff] }
 0x230   : > { %v2748_v42 = vpack.c.bf16 %v1506_v39, %v1500_v38  ;;  %v1854_v38 = vld [vmem:[%s4048_s5 + $0x28] sm:$0xff] }
 0x232   : > { %2677 = vmatpush1.bf16.msra.mxu1 %v2676_v43  ;;  %v2750_v43 = vpack.c.bf16 %v1519_v41, %v1513_v40  ;;  %v1871_v40 = vld [vmem:[%s4048_s5 + $0xb0] sm:$0xff]  ;;  %v1872_v41 = vld [vmem:[%s4048_s5 + $0xb8] sm:$0xff] }
 0x233   : > { %2711 = vmatprep.subr.bf16.mxu1 %v2710_v44  ;;  %v1512_v44 = vld [vmem:[#allocation8 + $0x9c0] sm:$0xff] }
 0x234   : > { %v2752_v48 = vpack.c.bf16 %v1518_v45, %v1512_v44  ;;  %v1510_v44 = vld [vmem:[#allocation8 + $0x9b0] sm:$0xff]  ;;  %v1517_v45 = vld [vmem:[#allocation8 + $0x9e8] sm:$0xff] }
 0x235   : > { %1333 = vmatmul.mubr.f32.vlgmr.msra.gmra.mrb[0].mxu1 %v3665_v37 }
 0x236   : > { %2713 = vmatpush1.bf16.msra.mxu1 %v2712_v49  ;;  %1474 = vmatprep.mubr.f32.mxu1 %v3318_v1  ;;  %v2754_v49 = vpack.c.bf16 %v1531_v47, %v1525_v46  ;;  %v1523_v46 = vld [vmem:[#allocation8 + $0xa18] sm:$0xff] }
 0x237   : > { %2715 = vmatprep.subr.bf16.mxu1 %v2714_v50  ;;  %v1524_v50 = vld [vmem:[#allocation8 + $0xa20] sm:$0xff] }
 0x23a   : > { %2717 = vmatpush1.bf16.msra.mxu1 %v2716_v55  ;;  %v1536_v55 = vld [vmem:[#allocation8 + $0xa80] sm:$0xff] }
 0x23b   : > { %2719 = vmatprep.subr.bf16.mxu1 %v2718_v56  ;;  %v1542_v56 = vld [vmem:[#allocation8 + $0xab0] sm:$0xff] }
 0x23c   : > { %v2760_v59 = vpack.c.bf16 %v1542_v56, %v1536_v55  ;;  %v1522_v55 = vld [vmem:[#allocation8 + $0xa10] sm:$0xff]  ;;  %v1529_v56 = vld [vmem:[#allocation8 + $0xa48] sm:$0xff] }
 0x23d   : > { %v2818_v3 = vpack.c.bf16 %v1535_v57, %v1529_v56  ;;  %v3793_v56 = vld [vmem:[#allocation10] sm:$0x3f] }
 0x23e   : > { %2721 = vmatpush1.bf16.msra.mxu1 %v2720_v61  ;;  %v1548_v61 = vld [vmem:[#allocation8 + $0xae0] sm:$0xff] }
 0x23f   : > { %2723 = vmatprep.subr.bf16.mxu1 %v2722_v62  ;;  %v1554_v62 = vld [vmem:[#allocation8 + $0xb10] sm:$0xff] }
 0x240   : > { %v2764_v4 = vpack.c.bf16 %v1554_v62, %v1548_v61  ;;  %v1875_v62 = vld [vmem:[%s4048_s5 + $0xd0] sm:$0xff] }
 0x242   : > { %2725 = vmatpush1.bf16.msra.mxu1 %v2724_v6  ;;  %v1560_v6 = vld [vmem:[#allocation8 + $0xb40] sm:$0xff] }
 0x243   : > { %2727 = vmatprep.subr.bf16.mxu1 %v2726_v7  ;;  %v1566_v7 = vld [vmem:[#allocation8 + $0xb70] sm:$0xff] }
 0x244   : > { %v2768_v10 = vpack.c.bf16 %v1566_v7, %v1560_v6  ;;  %v1541_v6 = vld [vmem:[#allocation8 + $0xaa8] sm:$0xff]  ;;  %v1547_v7 = vld [vmem:[#allocation8 + $0xad8] sm:$0xff] }
 0x245   : > { %v2822_v14 = vpack.c.bf16 %v1547_v7, %v1541_v6  ;;  %v1900_v6 = vld [vmem:[%s4048_s5 + $0x198] sm:$0xff] }
 0x246   : > { %2729 = vmatpush1.bf16.msra.mxu1 %v2728_v12  ;;  %v2770_v12 = vpack.c.bf16 %v1579_v9, %v1573_v8  ;;  %v2858_v9 = vpack.c.bf16 %v1876_v2, %v1875_v62  ;;  %v1881_v62 = vld [vmem:[%s4048_s5 + $0x100] sm:$0xff]  ;;  %v1882_v2 = vld [vmem:[%s4048_s5 + $0x108] sm:$0xff] }
 0x247   : > { %2731 = vmatprep.subr.bf16.mxu1 %v2730_v13  ;;  %v1578_v13 = vld [vmem:[#allocation8 + $0xbd0] sm:$0xff] }
 0x248   : > { %v2772_v21 = vpack.c.bf16 %v1578_v13, %v1572_v11  ;;  %v1860_v11 = vld [vmem:[%s4048_s5 + $0x58] sm:$0xff]  ;;  %v1877_v13 = vld [vmem:[%s4048_s5 + $0xe0] sm:$0xff] }
 0x24a   : > { %2733 = vmatpush1.bf16.msra.mxu1 %v2732_v24  ;;  %v1849_v24 = vld [vmem:[%s4048_s5] sm:$0xff] }
 0x24b   : > { %2735 = vmatprep.subr.bf16.mxu1 %v2734_v17  ;;  %v2838_v17 = vpack.c.bf16 %v1866_v16, %v1865_v15  ;;  %v1540_v15 = vld [vmem:[#allocation8 + $0xaa0] sm:$0xff]  ;;  %v1546_v16 = vld [vmem:[#allocation8 + $0xad0] sm:$0xff] }
 0x24d   : > { %2839 = vmatprep.subr.bf16.mxu0 %v2838_v17  ;;  %v1559_v17 = vld [vmem:[#allocation8 + $0xb38] sm:$0xff] }
 0x24e   : > { %2737 = vmatpush1.bf16.msra.mxu1 %v2736_v29  ;;  %v2840_v29 = vpack.c.bf16 %v1850_v18, %v1849_v24  ;;  %v1553_v24 = vld [vmem:[#allocation8 + $0xb08] sm:$0xff] }
 0x24f   : > { %2739 = vmatprep.subr.bf16.mxu1 %v2738_v22  ;;  %v2842_v22 = vpack.c.bf16 %v1868_v20, %v1867_v19  ;;  %v2862_v19 = vpack.c.bf16 %v1878_v0, %v1877_v13  ;;  %v1861_v20 = vld [vmem:[%s4048_s5 + $0x60] sm:$0xff] }
 0x250   : > { %2841 = vmatpush3.bf16.msra.mxu0 %v2840_v29  ;;  %v2824_v29 = vpack.c.bf16 %v1546_v16, %v1540_v15  ;;  %v1901_v0 = vld [vmem:[%s4048_s5 + $0x1a0] sm:$0xff] }
 0x251   : > { %2843 = vmatprep.subr.bf16.mxu0 %v2842_v22  ;;  %v2826_v22 = vpack.c.bf16 %v1559_v17, %v1553_v24  ;;  %v1885_v24 = vld [vmem:[%s4048_s5 + $0x120] sm:$0xff]  ;;  %v1886_v17 = vld [vmem:[%s4048_s5 + $0x128] sm:$0xff] }
 0x252   : > { %2741 = vmatpush1.bf16.msra.mxu1 %v2740_v28  ;;  %v1492_v28 = vld [vmem:[#allocation8 + $0x920] sm:$0xff] }
 0x253   : > { %2743 = vmatprep.subr.bf16.mxu1 %v2742_v30  ;;  %v1498_v30 = vld [vmem:[#allocation8 + $0x950] sm:$0xff] }
 0x254   : > { %v2808_v39 = vpack.c.bf16 %v1498_v30, %v1492_v28  ;;  %2845 = vmatpush3.bf16.msra.mxu0 %v2844_v34  ;;  %v2828_v30 = vpack.c.bf16 %v1558_v25, %v1552_v23  ;;  %v1577_v34 = vld [vmem:[#allocation8 + $0xbc8] sm:$0xff]  ;;  %v1905_v23 = vld [vmem:[%s4048_s5 + $0x1c0] sm:$0xff] }
 0x255   : > { %1475 = vmatmul.mubr.f32.vlgmr.msra.gmra.mrb[2].mxu1 %v3665_v37  ;;  %v2756_v37 = vpack.c.bf16 %v1530_v51, %v1524_v50  ;;  %v1856_v50 = vld [vmem:[%s4048_s5 + $0x38] sm:$0xff]  ;;  %v1906_v25 = vld [vmem:[%s4048_s5 + $0x1c8] sm:$0xff] }
 0x256   : > { %2745 = vmatpush1.bf16.msra.mxu1 %v2744_v35  ;;  %1650 = vmatprep.mubr.f32.mxu1 %v3318_v1  ;;  %v2846_v35 = vpack.c.bf16 %v1870_v31, %v1869_v26  ;;  %v1565_v26 = vld [vmem:[#allocation8 + $0xb68] sm:$0xff] }
 0x257   : > { %2747 = vmatprep.subr.bf16.mxu1 %v2746_v36  ;;  %v1853_v36 = vld [vmem:[%s4048_s5 + $0x20] sm:$0xff] }
 0x258   : > { %v2848_v47 = vpack.c.bf16 %v1854_v38, %v1853_v36  ;;  %2847 = vmatprep.subr.bf16.mxu0 %v2846_v35  ;;  %v1583_v35 = vld [vmem:[#allocation8 + $0xbf8] sm:$0xff] }
 0x259   : > { %v2834_v38 = vpack.c.bf16 %v1583_v35, %v1577_v34  ;;  %v1891_v35 = vld [vmem:[%s4048_s5 + $0x150] sm:$0xff] }
 0x25a   : > { %2749 = vmatpush1.bf16.msra.mxu1 %v2748_v42  ;;  %v2810_v42 = vpack.c.bf16 %v1511_v33, %v1505_v32  ;;  %2849 = vmatpush3.bf16.msra.mxu0 %v2848_v47  ;;  %v1564_v32 = vld [vmem:[#allocation8 + $0xb60] sm:$0xff]  ;;  %v1570_v33 = vld [vmem:[#allocation8 + $0xb90] sm:$0xff] }
 0x25b   : > { %2751 = vmatprep.subr.bf16.mxu1 %v2750_v43  ;;  %v1504_v43 = vld [vmem:[#allocation8 + $0x980] sm:$0xff]  ;;  %v2832_v36 = vpack.c.bf16 %v1570_v33, %v1564_v32  ;;  %v1908_v32 = vld [vmem:[%s4048_s5 + $0x1d8] sm:$0xff] }
 0x25c   : > { %v2812_v51 = vpack.c.bf16 %v1510_v44, %v1504_v43  ;;  %v1880_v43 = vld [vmem:[%s4048_s5 + $0xf8] sm:$0xff] }
 0x25e   : > { %2753 = vmatpush1.bf16.msra.mxu1 %v2752_v48  ;;  %v2850_v48 = vpack.c.bf16 %v1872_v41, %v1871_v40  ;;  %v1582_v40 = vld [vmem:[#allocation8 + $0xbf0] sm:$0xff] }
 0x25f   : > { %2755 = vmatprep.subr.bf16.mxu1 %v2754_v49  ;;  %v1855_v49 = vld [vmem:[%s4048_s5 + $0x30] sm:$0xff] }
 0x260   : > { %v2852_v58 = vpack.c.bf16 %v1856_v50, %v1855_v49  ;;  %2851 = vmatprep.subr.bf16.mxu0 %v2850_v48  ;;  %v1898_v48 = vld [vmem:[%s4048_s5 + $0x188] sm:$0xff] }
 0x262   : > { %2757 = vmatpush1.bf16.msra.mxu1 %v2756_v37  ;;  %v2814_v37 = vpack.c.bf16 %v1523_v46, %v1517_v45  ;;  %2853 = vmatpush3.bf16.msra.mxu0 %v2852_v58  ;;  %v1863_v45 = vld [vmem:[%s4048_s5 + $0x70] sm:$0xff]  ;;  %v1864_v46 = vld [vmem:[%s4048_s5 + $0x78] sm:$0xff] }
 0x263   : > { %2759 = vmatprep.subr.bf16.mxu1 %v2758_v54  ;;  %v1516_v54 = vld [vmem:[#allocation8 + $0x9e0] sm:$0xff]  ;;  %v2868_v47 = vpack.c.bf16 %v1864_v46, %v1863_v45  ;;  %v1911_v46 = vld [vmem:[%s4048_s5 + $0x1f0] sm:$0xff] }
 0x264   : > { %v2816_v61 = vpack.c.bf16 %v1522_v55, %v1516_v54 }
 0x266   : > { %2761 = vmatpush1.bf16.msra.mxu1 %v2760_v59  ;;  %v2854_v59 = vpack.c.bf16 %v1874_v53, %v1873_v52  ;;  %v1807_v52 = vlaneseq }
 0x267   : > { %2763 = vmatprep.subr.bf16.mxu1 %v2762_v60  ;;  %v1858_v60 = vld [vmem:[%s4048_s5 + $0x48] sm:$0xff] }
 0x268   : > { %2855 = vmatprep.subr.bf16.mxu0 %v2854_v59  ;;  %v3788_v53 = vshrl.u32 %v1807_v52, 7  ;;  %v1896_v52 = vld [vmem:[%s4048_s5 + $0x178] sm:$0xff] }
 0x26a   : > { %2765 = vmatpush1.bf16.msra.mxu1 %v2764_v4  ;;  %v1528_v4 = vld [vmem:[#allocation8 + $0xa40] sm:$0xff]  ;;  %v1821_v54 = vsub.s32 3, %v3788_v53  ;;  %v1813_v55 = vsub.s32 1, %v3788_v53  ;;  %v1829_v45 = vsub.s32 5, %v3788_v53 }
 0x26b   : > { %2767 = vmatprep.subr.bf16.mxu1 %v2766_v5  ;;  %v1534_v5 = vld [vmem:[#allocation8 + $0xa70] sm:$0xff] }
 0x26c   : > { %v1822_v58 = vrot.slane %v3793_v56, %v1821_v54  ;;  %v1814_v59 = vrot.slane %v3793_v56, %v1813_v55  ;;  %v1929_v54 = vld [vmem:[%s4048_s5 + $0x280] sm:$0xff]  ;;  %v1930_v55 = vld [vmem:[%s4048_s5 + $0x288] sm:$0xff] }
 0x26e   : > { %2769 = vmatpush1.bf16.msra.mxu1 %v2768_v10  ;;  %v1859_v10 = vld [vmem:[%s4048_s5 + $0x50] sm:$0xff] }
 0x26f   : > { %2771 = vmatprep.subr.bf16.mxu1 %v2770_v12  ;;  %v2820_v12 = vpack.c.bf16 %v1534_v5, %v1528_v4  ;;  %v2860_v18 = vpack.c.bf16 %v1860_v11, %v1859_v10  ;;  %v1899_v5 = vld [vmem:[%s4048_s5 + $0x190] sm:$0xff] }
 0x270   : > { %v2874_v10 = vpack.c.bf16 %v1900_v6, %v1899_v5  ;;  %v1883_v11 = vld [vmem:[%s4048_s5 + $0x110] sm:$0xff] }
 0x272   : > { %2773 = vmatpush1.bf16.msra.mxu1 %v2772_v21  ;;  %v1862_v21 = vld [vmem:[%s4048_s5 + $0x68] sm:$0xff] }
 0x273   : > { %2807 = vmatprep.subr.bf16.mxu1 %v2806_v27  ;;  %v1571_v27 = vld [vmem:[#allocation8 + $0xb98] sm:$0xff]  ;;  %v2864_v28 = vpack.c.bf16 %v1862_v21, %v1861_v20  ;;  %v2880_v20 = vpack.c.bf16 %v1886_v17, %v1885_v24 }
 0x274   : > { %v2830_v31 = vpack.c.bf16 %v1571_v27, %v1565_v26  ;;  %v2886_v27 = vpack.c.bf16 %v1906_v25, %v1905_v23  ;;  %v1921_v23 = vld [vmem:[%s4048_s5 + $0x240] sm:$0xff]  ;;  %v1922_v25 = vld [vmem:[%s4048_s5 + $0x248] sm:$0xff] }
 0x275   : > { %1651 = vmatmul.mubr.f32.vlgmr.msra.gmra.mrb[0].mxu1 %v3672_v63 }
 0x276   : > { %2809 = vmatpush1.bf16.msra.mxu1 %v2808_v39  ;;  %1792 = vmatprep.mubr.f32.mxu1 %v3318_v1  ;;  %v1857_v1 = vld [vmem:[%s4048_s5 + $0x40] sm:$0xff] }
 0x277   : > { %2811 = vmatprep.subr.bf16.mxu1 %v2810_v42  ;;  %v2856_v8 = vpack.c.bf16 %v1858_v60, %v1857_v1  ;;  %v1576_v39 = vld [vmem:[#allocation8 + $0xbc0] sm:$0xff]  ;;  %v1879_v42 = vld [vmem:[%s4048_s5 + $0xf0] sm:$0xff] }
 0x278   : > { %v2836_v41 = vpack.c.bf16 %v1582_v40, %v1576_v39  ;;  %v2866_v44 = vpack.c.bf16 %v1880_v43, %v1879_v42  ;;  %v1910_v39 = vld [vmem:[%s4048_s5 + $0x1e8] sm:$0xff]  ;;  %v1893_v43 = vld [vmem:[%s4048_s5 + $0x160] sm:$0xff] }
 0x279   : > { %2857 = vmatpush3.bf16.msra.mxu0 %v2856_v8  ;;  %v2872_v8 = vpack.c.bf16 %v1882_v2, %v1881_v62  ;;  %v1914_v62 = vld [vmem:[%s4048_s5 + $0x208] sm:$0xff] }
 0x27a   : > { %2813 = vmatpush1.bf16.msra.mxu1 %v2812_v51  ;;  %2859 = vmatprep.subr.bf16.mxu0 %v2858_v9 }
 0x27b   : > { %2815 = vmatprep.subr.bf16.mxu1 %v2814_v37  ;;  %v1809_v37 = vsub.s32 0, %v3788_v53 }
 0x27d   : > { %2861 = vmatpush3.bf16.msra.mxu0 %v2860_v18  ;;  %v1810_v57 = vrot.slane %v3793_v56, %v1809_v37  ;;  %v1903_v18 = vld [vmem:[%s4048_s5 + $0x1b0] sm:$0xff]  ;;  %v1830_v37 = vrot.slane %v3793_v56, %v1829_v45 }
 0x27e   : > { %2817 = vmatpush1.bf16.msra.mxu1 %v2816_v61  ;;  %2863 = vmatprep.subr.bf16.mxu0 %v2862_v19  ;;  %v1904_v19 = vld [vmem:[%s4048_s5 + $0x1b8] sm:$0xff]  ;;  %v1927_v45 = vld [vmem:[%s4048_s5 + $0x270] sm:$0xff] }
 0x27f   : > { %2819 = vmatprep.subr.bf16.mxu1 %v2818_v3  ;;  %v2882_v21 = vpack.c.bf16 %v1904_v19, %v1903_v18  ;;  %v1919_v18 = vld [vmem:[%s4048_s5 + $0x230] sm:$0xff]  ;;  %v1920_v19 = vld [vmem:[%s4048_s5 + $0x238] sm:$0xff] }
 0x281   : > { %2865 = vmatpush3.bf16.msra.mxu0 %v2864_v28  ;;  %v1889_v28 = vld [vmem:[%s4048_s5 + $0x140] sm:$0xff] }
 0x282   : > { %2821 = vmatpush1.bf16.msra.mxu1 %v2820_v12  ;;  %2867 = vmatprep.subr.bf16.mxu0 %v2866_v44  ;;  %v1884_v12 = vld [vmem:[%s4048_s5 + $0x118] sm:$0xff]  ;;  %v1894_v44 = vld [vmem:[%s4048_s5 + $0x168] sm:$0xff] }
 0x283   : > { %2823 = vmatprep.subr.bf16.mxu1 %v2822_v14  ;;  %v1902_v14 = vld [vmem:[%s4048_s5 + $0x1a8] sm:$0xff]  ;;  %v2876_v15 = vpack.c.bf16 %v1884_v12, %v1883_v11 }
 0x284   : > { %v2878_v16 = vpack.c.bf16 %v1902_v14, %v1901_v0  ;;  %v1934_v11 = vld [vmem:[%s4048_s5 + $0x2a8] sm:$0xff]  ;;  %v1917_v0 = vld [vmem:[%s4048_s5 + $0x220] sm:$0xff] }
 0x285   : > { %2869 = vmatpush3.bf16.msra.mxu0 %v2868_v47  ;;  %v1912_v47 = vld [vmem:[%s4048_s5 + $0x1f8] sm:$0xff]  ;;  %v1918_v14 = vld [vmem:[%s4048_s5 + $0x228] sm:$0xff] }
 0x286   : > { %2825 = vmatpush1.bf16.msra.mxu1 %v2824_v29  ;;  %v1887_v29 = vld [vmem:[%s4048_s5 + $0x130] sm:$0xff]  ;;  %v2912_v24 = vpack.c.bf16 %v1918_v14, %v1917_v0 }
 0x287   : > { %2827 = vmatprep.subr.bf16.mxu1 %v2826_v22  ;;  %v1888_v22 = vld [vmem:[%s4048_s5 + $0x138] sm:$0xff] }
 0x288   : > { %v2884_v26 = vpack.c.bf16 %v1888_v22, %v1887_v29  ;;  %v2916_v29 = vpack.c.bf16 %v1920_v19, %v1919_v18 }
 0x28a   : > { %2829 = vmatpush1.bf16.msra.mxu1 %v2828_v30  ;;  %v1890_v30 = vld [vmem:[%s4048_s5 + $0x148] sm:$0xff] }
 0x28b   : > { %2831 = vmatprep.subr.bf16.mxu1 %v2830_v31  ;;  %v1907_v31 = vld [vmem:[%s4048_s5 + $0x1d0] sm:$0xff]  ;;  %v2888_v33 = vpack.c.bf16 %v1890_v30, %v1889_v28  ;;  %v2920_v28 = vpack.c.bf16 %v1922_v25, %v1921_v23 }
 0x28c   : > { %v2890_v34 = vpack.c.bf16 %v1908_v32, %v1907_v31  ;;  %v1923_v31 = vld [vmem:[%s4048_s5 + $0x250] sm:$0xff]  ;;  %v1924_v32 = vld [vmem:[%s4048_s5 + $0x258] sm:$0xff] }
 0x28e   : > { %2833 = vmatpush1.bf16.msra.mxu1 %v2832_v36  ;;  %v1892_v36 = vld [vmem:[%s4048_s5 + $0x158] sm:$0xff] }
 0x28f   : > { %2835 = vmatprep.subr.bf16.mxu1 %v2834_v38  ;;  %v1909_v38 = vld [vmem:[%s4048_s5 + $0x1e0] sm:$0xff]  ;;  %v2892_v40 = vpack.c.bf16 %v1892_v36, %v1891_v35  ;;  %v2924_v35 = vpack.c.bf16 %v1924_v32, %v1923_v31  ;;  %v1825_v36 = vsub.s32 4, %v3788_v53 }
 0x290   : > { %v2894_v42 = vpack.c.bf16 %v1910_v39, %v1909_v38  ;;  %v1925_v39 = vld [vmem:[%s4048_s5 + $0x260] sm:$0xff] }
 0x292   : > { %2837 = vmatpush1.bf16.msra.mxu1 %v2836_v41  ;;  %v1817_v41 = vsub.s32 2, %v3788_v53 }
 0x295   : > { %1793 = vmatmul.mubr.f32.vlgmr.msra.gmra.mrb[2].mxu1 %v3672_v63  ;;  %v1897_v63 = vld [vmem:[%s4048_s5 + $0x180] sm:$0xff] }
 0x296   : > { %v2870_v49 = vpack.c.bf16 %v1898_v48, %v1897_v63  ;;  %v2896_v63 = vpack.c.bf16 %v1894_v44, %v1893_v43  ;;  %v1818_v48 = vrot.slane %v3793_v56, %v1817_v41  ;;  %v1943_v41 = vld [vmem:[%s4048_s5 + $0x2f0] sm:$0xff]  ;;  %v1826_v43 = vrot.slane %v3793_v56, %v1825_v36 }
 0x298   : > { %2871 = vmatprep.subr.bf16.mxu0 %v2870_v49  ;;  %v2898_v49 = vpack.c.bf16 %v1912_v47, %v1911_v46  ;;  %v1928_v46 = vld [vmem:[%s4048_s5 + $0x278] sm:$0xff] }
 0x299   : > { %v2932_v47 = vpack.c.bf16 %v1928_v46, %v1927_v45 }
 0x2e8   : > { %v3786_v50 = vpop.f32.mrb[2].mxu0 }
 0x2e9   : > { %v1725_v51 = vpop.f32.mrb[3].mxu0 }
 0x2ea   : > { %v1840_v3 = vadd.f32 %v1822_v58, %v1725_v51  ;;  %v1895_v51 = vld [vmem:[%s4048_s5 + $0x170] sm:$0xff] }
 0x2eb   : > { %v2900_v58 = vpack.c.bf16 %v1896_v52, %v1895_v51  ;;  %v1945_v52 = vld [vmem:[#allocation11] sm:$0x1] }
 0x2ec   : > { %v1846_v13 = vmax.f32 %v1840_v3, 0.0  ;;  %v1931_v3 = vld [vmem:[%s4048_s5 + $0x290] sm:$0xff] }
 0x348   : > { %v1652_v1 = vpop.f32.mrb[0].mxu1 }
 0x349   : > { %v1837_v60 = vadd.f32 %v1810_v57, %v1652_v1  ;;  %v1654_v61 = vpop.f32.mrb[1].mxu1 }
 0x34a   : > { %v1838_v4 = vadd.f32 %v1814_v59, %v1654_v61  ;;  %v1839_v59 = vadd.f32 %v1818_v48, %v3786_v50  ;;  %v1913_v61 = vld [vmem:[%s4048_s5 + $0x200] sm:$0xff]  ;;  %v1932_v50 = vld [vmem:[%s4048_s5 + $0x298] sm:$0xff] }
 0x34b   : > { %v1843_v9 = vmax.f32 %v1837_v60, 0.0  ;;  %v2902_v60 = vpack.c.bf16 %v1930_v55, %v1929_v54  ;;  %v2904_v5 = vpack.c.bf16 %v1914_v62, %v1913_v61 }
 0x34c   : > { %v1844_v7 = vmax.f32 %v1838_v4, 0.0  ;;  %v1845_v6 = vmax.f32 %v1839_v59, 0.0 }
 0x34e   : > { %2010 = vmatprep.mubr.f32.mxu0 %v1844_v7  ;;  %v2906_v7 = vpack.c.bf16 %v1932_v50, %v1931_v3 }
 0x34f   : > { %2011 = vmatmul.mubr.f32.vlgmr.msra.gmra.mrb[4].mxu0 %v1843_v9  ;;  %v1916_v9 = vld [vmem:[%s4048_s5 + $0x218] sm:$0xff] }
 0x350   : > { %2873 = vmatpush3.bf16.msra.mxu0 %v2872_v8  ;;  %2080 = vmatprep.mubr.f32.mxu0 %v1846_v13  ;;  %v1915_v8 = vld [vmem:[%s4048_s5 + $0x210] sm:$0xff] }
 0x351   : > { %2875 = vmatprep.subr.bf16.mxu0 %v2874_v10  ;;  %v1933_v10 = vld [vmem:[%s4048_s5 + $0x2a0] sm:$0xff]  ;;  %v2908_v12 = vpack.c.bf16 %v1916_v9, %v1915_v8 }
 0x352   : > { %v2910_v13 = vpack.c.bf16 %v1934_v11, %v1933_v10 }
 0x354   : > { %2877 = vmatpush3.bf16.msra.mxu0 %v2876_v15  ;;  %v1935_v15 = vld [vmem:[%s4048_s5 + $0x2b0] sm:$0xff] }
 0x355   : > { %2879 = vmatprep.subr.bf16.mxu0 %v2878_v16  ;;  %v1936_v16 = vld [vmem:[%s4048_s5 + $0x2b8] sm:$0xff] }
 0x356   : > { %v2914_v17 = vpack.c.bf16 %v1936_v16, %v1935_v15 }
 0x358   : > { %2881 = vmatpush3.bf16.msra.mxu0 %v2880_v20  ;;  %v1937_v20 = vld [vmem:[%s4048_s5 + $0x2c0] sm:$0xff] }
 0x359   : > { %2883 = vmatprep.subr.bf16.mxu0 %v2882_v21  ;;  %v1938_v21 = vld [vmem:[%s4048_s5 + $0x2c8] sm:$0xff] }
 0x35a   : > { %v2918_v22 = vpack.c.bf16 %v1938_v21, %v1937_v20 }
 0x35c   : > { %2885 = vmatpush3.bf16.msra.mxu0 %v2884_v26  ;;  %v1939_v26 = vld [vmem:[%s4048_s5 + $0x2d0] sm:$0xff] }
 0x35d   : > { %2887 = vmatprep.subr.bf16.mxu0 %v2886_v27  ;;  %v1940_v27 = vld [vmem:[%s4048_s5 + $0x2d8] sm:$0xff] }
 0x35e   : > { %v2922_v30 = vpack.c.bf16 %v1940_v27, %v1939_v26 }
 0x360   : > { %2889 = vmatpush3.bf16.msra.mxu0 %v2888_v33  ;;  %v1941_v33 = vld [vmem:[%s4048_s5 + $0x2e0] sm:$0xff] }
 0x361   : > { %2891 = vmatprep.subr.bf16.mxu0 %v2890_v34  ;;  %v1942_v34 = vld [vmem:[%s4048_s5 + $0x2e8] sm:$0xff] }
 0x362   : > { %v2926_v38 = vpack.c.bf16 %v1942_v34, %v1941_v33 }
 0x364   : > { %2893 = vmatpush3.bf16.msra.mxu0 %v2892_v40  ;;  %v1926_v40 = vld [vmem:[%s4048_s5 + $0x268] sm:$0xff] }
 0x365   : > { %2895 = vmatprep.subr.bf16.mxu0 %v2894_v42  ;;  %v1944_v42 = vld [vmem:[%s4048_s5 + $0x2f8] sm:$0xff]  ;;  %v2928_v53 = vpack.c.bf16 %v1926_v40, %v1925_v39 }
 0x366   : > { %v2930_v44 = vpack.c.bf16 %v1944_v42, %v1943_v41 }
 0x368   : > { %2897 = vmatpush3.bf16.msra.mxu0 %v2896_v63  ;;  %v3898_v57 = vpop.f32.mrb[2].mxu1 }
 0x369   : > { %v1796_v1 = vpop.f32.mrb[3].mxu1  ;;  %2899 = vmatprep.subr.bf16.mxu0 %v2898_v49  ;;  %v1841_v63 = vadd.f32 %v1826_v43, %v3898_v57 }
 0x36a   : > { %v1842_v2 = vadd.f32 %v1830_v37, %v1796_v1 }
 0x36b   : > { %v1847_v48 = vmax.f32 %v1841_v63, 0.0 }
 0x36c   : > { %v1848_v4 = vmax.f32 %v1842_v2, 0.0  ;;  %2901 = vmatpush3.bf16.msra.mxu0 %v2900_v58 }
 0x36d   : > { %2903 = vmatprep.subr.bf16.mxu0 %v2902_v60 }
 0x36f   : > { %2081 = vmatmul.mubr.f32.vlgmr.msra.gmra.mrb[6].mxu0 %v1845_v6 }
 0x370   : > { %2905 = vmatpush3.bf16.msra.mxu0 %v2904_v5  ;;  %2150 = vmatprep.mubr.f32.mxu0 %v1848_v4 }
 0x371   : > { %2907 = vmatprep.subr.bf16.mxu0 %v2906_v7 }
 0x374   : > { %2909 = vmatpush3.bf16.msra.mxu0 %v2908_v12 }
 0x375   : > { %2911 = vmatprep.subr.bf16.mxu0 %v2910_v13 }
 0x378   : > { %2913 = vmatpush3.bf16.msra.mxu0 %v2912_v24 }
 0x379   : > { %2915 = vmatprep.subr.bf16.mxu0 %v2914_v17 }
 0x37c   : > { %2917 = vmatpush3.bf16.msra.mxu0 %v2916_v29 }
 0x37d   : > { %2919 = vmatprep.subr.bf16.mxu0 %v2918_v22 }
 0x380   : > { %2921 = vmatpush3.bf16.msra.mxu0 %v2920_v28 }
 0x381   : > { %2923 = vmatprep.subr.bf16.mxu0 %v2922_v30 }
 0x384   : > { %2925 = vmatpush3.bf16.msra.mxu0 %v2924_v35 }
 0x385   : > { %2927 = vmatprep.subr.bf16.mxu0 %v2926_v38 }
 0x388   : > { %2929 = vmatpush3.bf16.msra.mxu0 %v2928_v53 }
 0x389   : > { %2931 = vmatprep.subr.bf16.mxu0 %v2930_v44 }
 0x38c   : > { %2933 = vmatpush3.bf16.msra.mxu0 %v2932_v47 }
 0x38f   : > { %2151 = vmatmul.mubr.f32.vlgmr.msra.gmra.mrb[8].mxu0 %v1847_v48 }
 0x422   : > { %v2350_v56 = vpop.f32.mrb[4].mxu0 }
 0x423   : > { %v2351_v49 = vpop.f32.mrb[5].mxu0 }
 0x424   : > { %v2352_v51 = vadd.f32 %v2351_v49, %v2350_v56 }
 0x426   : > { %v2013_v55 = vadd.f32 %v2352_v51, %v1945_v52 }
 0x442   : > { %v2385_v37 = vpop.f32.mrb[6].mxu0 }
 0x443   : > { %v2386_v54 = vpop.f32.mrb[7].mxu0 }
 0x444   : > { %v2387_v58 = vadd.f32 %v2386_v54, %v2385_v37 }
 0x446   : > { %v2083_v59 = vadd.f32 %v2387_v58, %v2013_v55 }
 0x462   : > { %v2420_v1 = vpop.f32.mrb[8].mxu0 }
 0x463   : > { %v2421_v60 = vpop.f32.mrb[9].mxu0 }
 0x464   : > { %v2422_v57 = vadd.f32 %v2421_v60, %v2420_v1 }
 0x466   : > { %v2153_v61 = vadd.f32 %v2422_v57, %v2083_v59 }
 0x468   : > { %2157 = vst.msk [vmem:[%s362_s21] sm:$0x1] %vm2156_vm7, %v2153_v61 }
 0x469   : > { %3239 = shalt.err (!%p3236_p8)
}
 0x46a   : > { %s3240_s22 = scalar_lea.hbm %s3999_s20, 16  ;;  %s3244_s23 = scalar_lea.hbm %s4050_s7, 32 }
 0x46b   : > { %p3241_p6 = scmp.ne.s32.totalorder %s3999_s20, %s3240_s22  ;;  %p3245_p3 = scmp.lt.u32.totalorder %s3999_s20, %s4050_s7 }
 0x46c   : > { %p3246_p0 = scmp.lt.u32.totalorder %s3244_s23, %s3240_s22  ;;  %p3248_p2 = scmp.lt.u32.totalorder %s3240_s22, %s3999_s20 }
 0x46d   : > { %p3242_p9 = pnand %p3241_p6, %p4071_p7 }
 0x46e   : > { %p3247_p5 = por %p3246_p0, %p3245_p3 }
 0x46f   : > { %p3243_p4 = pneg %p3242_p9 }
 0x470   : > { %p3249_p10 = por %p3248_p2, %p3247_p5 }
 0x472   : > { %p3250_p1 = pnand %p3249_p10, %p3243_p4 }
 0x474   : > { %3253 = shalt.err (!%p3250_p1)
}
 0x475   : > { %2974 = dma.vmem_to_hbm [thread:$0]  (%p4071_p7), %s4001_s12, 16, %s3999_s20, %s2159_s13  }
 0x476 PF: > { %s2183_s8 = sand.u32 1, %s3292_s24   ;;  %p4072_p11 = scmp.ne.s32.totalorder %s4061_s29, 0 }
 0x477   : > { %p4073_p12 = scmp.ge.s32.totalorder %s3304_s27, 2  ;;  %s2184_s28 = scalar_lea.sflag [#allocation4], %s2183_s8 }
 0x479   : > { %p2997_p13 = pnand %p4073_p12, %p4072_p11 }
 0x47b   : > { %3287 = dma.done.wait (!%p2997_p13), %s2184_s28, 16  }
 0x47c   : > { %3289 = vsyncadd (!%p2997_p13), %s2184_s28, 4294967280  ;;  %p23_p8 = scmp.ge.s32.totalorder %s3517_s11, 4   ;;  %s4074_s24 = smov %s3296_s25 }
 0x47d   : > { %s4075_s25 = smov %s3300_s26  ;;  %s4076_s26 = smov %s3529_s18 }
 0x47e   : > { %s4077_s27 = smov %s3517_s11  ;;  %25 = sbr.rel (!%p23_p8) target bundleno = 8 (0x8), region = 116 }
 0x485   :  { %2188 = vsyncpa [#allocation3], 1 }
 0x486   :  { %2190 = vsyncpa [#allocation3 + $0x1], 1 }
 0x487   :  { %2191 = vsyncpa [#allocation6], 1 }
 0x488   :  { %2192 = vsyncpa [#allocation9], 1 }
 0x489   :  { %2193 = vsyncpa [#allocation12], 1 }
 0x48a   :  { %2194 = vsyncpa [#allocation4], 1 }
 0x48b   :  { %2196 = vsyncpa [#allocation4 + $0x1], 1 }

</bundles_post_ra>
